<compile_context>
chip_gen: v6e
topology: v6e:2x2x1
jax: 0.10.0
libtpu: 0.0.40
codegen_flags: <defaults>
</compile_context>

<pallas_src>
import jax
import jax.numpy as jnp
from jax import lax
from jax.experimental import pallas as pl
from jax.experimental.pallas import tpu as pltpu


# dot_general dimension numbers (2-D operands, no batch dims).
_NT = (((1,), (1,)), ((), ()))   # A[M,K] . B[N,K]  -> [M,N]   (rhs transposed)
_TN = (((0,), (0,)), ((), ()))   # A[K,M] . B[K,N]  -> [M,N]   (lhs transposed)


def _make_mlp_kernel(n_timesteps, matmul_dtype):
    """Build the fused 6-layer MLP kernel body (feature-major hot path)."""

    def cast(x):
        return x if matmul_dtype is None else x.astype(matmul_dtype)

    def kernel(q_ref, n_ref, ts_ref,
               w1q, w1n, w1t, b1,
               w2, b2, w3, b3, w4, b4, w5, b5,
               w6t, b6,
               o_ref):
        tb = q_ref.shape[0]

        # Fused nn.Embedding gather: one-hot(timesteps) @ (w1_t @ emb.T).T
        # TODO(synk): for very large n_timesteps (e.g. 1000+) the one-hot
        # matmul dominates FLOPs; switch to a pre-gathered [H, B] tile then.
        ts = ts_ref[...]                                            # (TB, 1) i32
        ids = lax.broadcasted_iota(jnp.int32, (tb, n_timesteps), 1)
        onehot = (ts == ids).astype(
            jnp.float32 if matmul_dtype is None else matmul_dtype)  # (TB, n_t)

        # Layer 1: h = W1 @ [q ; n ; emb[t]]^T + b1, as three NT matmuls taken
        # directly from the row-major input tiles -> feature-major [H, TB]
        # (batch on the lane axis, fully lane-dense elementwise work).
        h = (lax.dot_general(w1q[...], cast(q_ref[...]), _NT,
                             preferred_element_type=jnp.float32)
             + lax.dot_general(w1n[...], cast(n_ref[...]), _NT,
                               preferred_element_type=jnp.float32)
             + lax.dot_general(w1t[...], onehot, _NT,
                               preferred_element_type=jnp.float32)
             + b1[...])                                             # (H,1) bcast
        h = jnp.maximum(h, 0.0)

        # Layers 2-5: Linear + ReLU, lane-dense [H, TB], f32 accumulation.
        for w, b in ((w2, b2), (w3, b3), (w4, b4), (w5, b5)):
            h = jnp.maximum(
                jnp.dot(w[...], cast(h), preferred_element_type=jnp.float32)
                + b[...], 0.0)

        # Layer 6: produce the row-major (TB, d_in) tile directly
        # (out = h^T @ w6^T, TN pattern) so no wrapper-side transpose exists.
        out = lax.dot_general(cast(h), w6t[...], _TN,
                              preferred_element_type=jnp.float32) + b6[...]
        o_ref[...] = out.astype(o_ref.dtype)

    return kernel


def _const_block_spec(shape):
    """Full-array constant block, single-buffered when supported."""
    index_map = lambda i: (0,) * len(shape)
    try:
        return pl.BlockSpec(shape, index_map, pipeline_mode=pl.Buffered(1))
    except TypeError:  # older JAX without BlockSpec(pipeline_mode=...)
        return pl.BlockSpec(shape, index_map)


def _select_batch_tile(batch, desired):
    """128-aligned tile dividing `batch`; keeps grid >= 2 when possible (v7x)."""
    if batch % 128 != 0:
        return batch                      # single full-extent (lane-padded) block
    desired = max(128, (min(desired, batch) // 128) * 128)
    tile = min(desired, max(128, ((batch // 2) // 128) * 128))
    while batch % tile != 0:
        tile -= 128
    return tile


def prepare_params(params, d_in, *, matmul_dtype=None):
    """One-time layout transform of PyTorch-style params for the kernel.

    params: 'emb' [n_t, d_emb], 'w1'..'w6' [out, in], 'b1'..'b6' [out].
    All transformed tensors are parameter-sized (tiny); do this once.
    """
    wd = jnp.float32 if matmul_dtype is None else matmul_dtype
    w1 = params["w1"]
    d_emb = params["emb"].shape[1]
    assert w1.shape[1] == 2 * d_in + d_emb
    prepped = {
        "w1_q": w1[:, :d_in].astype(wd),
        "w1_n": w1[:, d_in:2 * d_in].astype(wd),
        # Fold the embedding table into layer-1's time weights:
        #   w1_t @ emb[t]  ==  (w1_t @ emb.T)[:, t]
        "w1_t_emb": (w1[:, 2 * d_in:] @ params["emb"].T).astype(wd),  # [H, n_t]
        "b1": params["b1"][:, None].astype(jnp.float32),              # [H, 1]
    }
    for li in range(2, 6):
        prepped[f"w{li}"] = params[f"w{li}"].astype(wd)
        prepped[f"b{li}"] = params[f"b{li}"][:, None].astype(jnp.float32)
    prepped["w6_t"] = params["w6"].T.astype(wd)                       # [H, d_in]
    prepped["b6"] = params["b6"][None, :].astype(jnp.float32)         # [1, d_in]
    return prepped


def diffusion_mlp_forward(query_embed, noisy_embed, timesteps, prepped,
                          *, batch_tile=512, matmul_dtype=None):
    """Forward pass matching DiffusionMLP.forward. Returns [B, d_in] f32."""
    B, d_in = query_embed.shape
    H, n_t = prepped["w1_t_emb"].shape

    tb = _select_batch_tile(B, batch_tile)
    grid = (B // tb,)

    q = query_embed
    n = noisy_embed
    if matmul_dtype is not None:          # halve activation HBM bytes (v6e/v7x)
        q = q.astype(matmul_dtype)
        n = n.astype(matmul_dtype)
    ts2d = timesteps.astype(jnp.int32).reshape(B, 1)

    weight_args = [prepped["w1_q"], prepped["w1_n"], prepped["w1_t_emb"],
                   prepped["b1"]]
    for li in range(2, 6):
        weight_args += [prepped[f"w{li}"], prepped[f"b{li}"]]
    weight_args += [prepped["w6_t"], prepped["b6"]]

    def row_spec(feat):
        return pl.BlockSpec((tb, feat), lambda i: (i, 0))

    in_specs = [row_spec(d_in), row_spec(d_in), row_spec(1)]
    in_specs += [_const_block_spec(a.shape) for a in weight_args]
    out_spec = pl.BlockSpec((tb, d_in), lambda i: (i, 0))

    # VMEM budget: double-buffered I/O tiles (lane-padded to 128) +
    # weights (2x in case single-buffering falls back) + headroom. 64 MiB cap
    # (v7x per-TC VMEM) guards scaled-up d_hidden.
    def tile_bytes(feat, itemsize):
        return tb * max(feat, 128) * itemsize
    io_tile_bytes = (tile_bytes(d_in, q.dtype.itemsize)
                     + tile_bytes(d_in, n.dtype.itemsize)
                     + tile_bytes(1, 4)
                     + tile_bytes(d_in, 4))
    wb_bytes = sum(int(a.size) * a.dtype.itemsize for a in weight_args)
    vmem_limit = int(min(2 * io_tile_bytes + 2 * wb_bytes + (8 << 20), 64 << 20))

    out = pl.pallas_call(
        _make_mlp_kernel(n_t, matmul_dtype),
        out_shape=jax.ShapeDtypeStruct((B, d_in), jnp.float32),
        grid_spec=pltpu.PrefetchScalarGridSpec(
            num_scalar_prefetch=0,
            grid=grid,
            in_specs=in_specs,
            out_specs=out_spec,
        ),
        compiler_params=pltpu.CompilerParams(
            dimension_semantics=("parallel",),   # batch tiles split across TCs
            vmem_limit_bytes=vmem_limit,
        ),
    )(q, n, ts2d, *weight_args)
    return out


def init_params(key, n_timesteps, d_embedding, d_in, d_hidden):
    """Deterministic synthetic parameters in PyTorch layout."""
    dims = [d_in * 2 + d_embedding] + [d_hidden] * 5 + [d_in]
    keys = jax.random.split(key, 1 + 2 * 6)
    params = {"emb": jax.random.normal(keys[0], (n_timesteps, d_embedding),
                                       jnp.float32)}
    for li in range(6):
        fan_in, fan_out = dims[li], dims[li + 1]
        scale = 1.0 / jnp.sqrt(fan_in)
        params[f"w{li + 1}"] = scale * jax.random.normal(
            keys[1 + 2 * li], (fan_out, fan_in), jnp.float32)      # [out, in]
        params[f"b{li + 1}"] = scale * jax.random.normal(
            keys[2 + 2 * li], (fan_out,), jnp.float32)             # [out]
    return params


def _reference_forward(query_embed, noisy_embed, timesteps, params):
    """Pure-JAX reference with PyTorch semantics (gather + concat + Linears)."""
    t_emb = jnp.take(params["emb"], timesteps, axis=0)
    h = jnp.concatenate([query_embed, noisy_embed, t_emb], -1)
    for li in range(1, 6):
        h = jnp.maximum(h @ params[f"w{li}"].T + params[f"b{li}"], 0.0)
    return h @ params["w6"].T + params["b6"]


if __name__ == "__main__":
    # Small shapes consistent with the module. B is 128-aligned so activation
    # tiles are lane-dense and tile selection yields grid=(2,) (both v7x TCs).
    n_timesteps, d_embedding, d_in, d_hidden = 10, 16, 16, 32
    B = 512

    key = jax.random.PRNGKey(0)
    k_params, k_q, k_n, k_t = jax.random.split(key, 4)

    params = init_params(k_params, n_timesteps, d_embedding, d_in, d_hidden)
    query_embed = jax.random.normal(k_q, (B, d_in), jnp.float32)
    noisy_embed = jax.random.normal(k_n, (B, d_in), jnp.float32)
    timesteps = jax.random.randint(k_t, (B,), 0, n_timesteps, jnp.int32)

    # f32 path for the 1e-4 tolerance; pass matmul_dtype=jnp.bfloat16 to both
    # prepare_params and diffusion_mlp_forward on v6e/v7x for the bf16 path.
    prepped = prepare_params(params, d_in)
    out = diffusion_mlp_forward(query_embed, noisy_embed, timesteps, prepped,
                                batch_tile=512)
    out = jax.block_until_ready(out)

    ref = _reference_forward(query_embed, noisy_embed, timesteps, params)
    assert out.shape == (B, d_in)
    assert jnp.allclose(out, ref, atol=1e-4, rtol=1e-4), "mismatch vs reference"

    print("KERNEL_OK")
</pallas_src>

<mosaic_0001>
module attributes {stable_mosaic.version = 11 : i64} {
  func.func @kernel(%arg0: i32, %arg1: memref<256x16xf32, #tpu.memory_space<vmem>>, %arg2: memref<256x16xf32, #tpu.memory_space<vmem>>, %arg3: memref<256x1xi32, #tpu.memory_space<vmem>>, %arg4: memref<32x16xf32, #tpu.memory_space<vmem>>, %arg5: memref<32x16xf32, #tpu.memory_space<vmem>>, %arg6: memref<32x10xf32, #tpu.memory_space<vmem>>, %arg7: memref<32x1xf32, #tpu.memory_space<vmem>>, %arg8: memref<32x32xf32, #tpu.memory_space<vmem>>, %arg9: memref<32x1xf32, #tpu.memory_space<vmem>>, %arg10: memref<32x32xf32, #tpu.memory_space<vmem>>, %arg11: memref<32x1xf32, #tpu.memory_space<vmem>>, %arg12: memref<32x32xf32, #tpu.memory_space<vmem>>, %arg13: memref<32x1xf32, #tpu.memory_space<vmem>>, %arg14: memref<32x32xf32, #tpu.memory_space<vmem>>, %arg15: memref<32x1xf32, #tpu.memory_space<vmem>>, %arg16: memref<32x16xf32, #tpu.memory_space<vmem>>, %arg17: memref<1x16xf32, #tpu.memory_space<vmem>>, %arg18: memref<256x16xf32, #tpu.memory_space<vmem>>) attributes {dimension_semantics = [#tpu.dimension_semantics<parallel>], iteration_bounds = array<i64: 2>, scalar_prefetch = 0 : i64, scratch_operands = 0 : i64, tpu.core_type = #tpu.core_type<tc>, window_params = [{transform_indices = @transform_0, window_bounds = array<i64: 256, 16>}, {transform_indices = @transform_1, window_bounds = array<i64: 256, 16>}, {transform_indices = @transform_2, window_bounds = array<i64: 256, 1>}, {pipeline_mode = #tpu.pipeline_mode<synchronous>, transform_indices = @transform_3, window_bounds = array<i64: 32, 16>}, {pipeline_mode = #tpu.pipeline_mode<synchronous>, transform_indices = @transform_4, window_bounds = array<i64: 32, 16>}, {pipeline_mode = #tpu.pipeline_mode<synchronous>, transform_indices = @transform_5, window_bounds = array<i64: 32, 10>}, {pipeline_mode = #tpu.pipeline_mode<synchronous>, transform_indices = @transform_6, window_bounds = array<i64: 32, 1>}, {pipeline_mode = #tpu.pipeline_mode<synchronous>, transform_indices = @transform_7, window_bounds = array<i64: 32, 32>}, {pipeline_mode = #tpu.pipeline_mode<synchronous>, transform_indices = @transform_8, window_bounds = array<i64: 32, 1>}, {pipeline_mode = #tpu.pipeline_mode<synchronous>, transform_indices = @transform_9, window_bounds = array<i64: 32, 32>}, {pipeline_mode = #tpu.pipeline_mode<synchronous>, transform_indices = @transform_10, window_bounds = array<i64: 32, 1>}, {pipeline_mode = #tpu.pipeline_mode<synchronous>, transform_indices = @transform_11, window_bounds = array<i64: 32, 32>}, {pipeline_mode = #tpu.pipeline_mode<synchronous>, transform_indices = @transform_12, window_bounds = array<i64: 32, 1>}, {pipeline_mode = #tpu.pipeline_mode<synchronous>, transform_indices = @transform_13, window_bounds = array<i64: 32, 32>}, {pipeline_mode = #tpu.pipeline_mode<synchronous>, transform_indices = @transform_14, window_bounds = array<i64: 32, 1>}, {pipeline_mode = #tpu.pipeline_mode<synchronous>, transform_indices = @transform_15, window_bounds = array<i64: 32, 16>}, {pipeline_mode = #tpu.pipeline_mode<synchronous>, transform_indices = @transform_16, window_bounds = array<i64: 1, 16>}, {transform_indices = @transform_17, window_bounds = array<i64: 256, 16>}]} {
    %c0 = arith.constant 0 : index
    %c0_0 = arith.constant 0 : index
    %0 = vector.load %arg3[%c0, %c0_0] : memref<256x1xi32, #tpu.memory_space<vmem>>, vector<256x1xi32>
    %1 = tpu.iota {dimensions = array<i32: 1>} : vector<256x10xi32>
    %2 = vector.broadcast %0 : vector<256x1xi32> to vector<256x10xi32>
    %3 = arith.cmpi eq, %2, %1 : vector<256x10xi32>
    %4 = arith.extui %3 : vector<256x10xi1> to vector<256x10xi32>
    %5 = arith.sitofp %4 : vector<256x10xi32> to vector<256x10xf32>
    %c0_1 = arith.constant 0 : index
    %c0_2 = arith.constant 0 : index
    %6 = vector.load %arg4[%c0_1, %c0_2] : memref<32x16xf32, #tpu.memory_space<vmem>>, vector<32x16xf32>
    %c0_3 = arith.constant 0 : index
    %c0_4 = arith.constant 0 : index
    %7 = vector.load %arg1[%c0_3, %c0_4] : memref<256x16xf32, #tpu.memory_space<vmem>>, vector<256x16xf32>
    %cst = arith.constant dense<0.000000e+00> : vector<32x256xf32>
    %8 = tpu.matmul %6, %7, %cst {dimension_numbers = #tpu.dot_dimension_numbers<[1], [1], [0], [0], [0, 0, 1, 0], [], []>} : vector<32x16xf32>, vector<256x16xf32>, vector<32x256xf32> -> vector<32x256xf32>
    %c0_5 = arith.constant 0 : index
    %c0_6 = arith.constant 0 : index
    %9 = vector.load %arg5[%c0_5, %c0_6] : memref<32x16xf32, #tpu.memory_space<vmem>>, vector<32x16xf32>
    %c0_7 = arith.constant 0 : index
    %c0_8 = arith.constant 0 : index
    %10 = vector.load %arg2[%c0_7, %c0_8] : memref<256x16xf32, #tpu.memory_space<vmem>>, vector<256x16xf32>
    %cst_9 = arith.constant dense<0.000000e+00> : vector<32x256xf32>
    %11 = tpu.matmul %9, %10, %cst_9 {dimension_numbers = #tpu.dot_dimension_numbers<[1], [1], [0], [0], [0, 0, 1, 0], [], []>} : vector<32x16xf32>, vector<256x16xf32>, vector<32x256xf32> -> vector<32x256xf32>
    %12 = arith.addf %8, %11 : vector<32x256xf32>
    %c0_10 = arith.constant 0 : index
    %c0_11 = arith.constant 0 : index
    %13 = vector.load %arg6[%c0_10, %c0_11] : memref<32x10xf32, #tpu.memory_space<vmem>>, vector<32x10xf32>
    %cst_12 = arith.constant dense<0.000000e+00> : vector<32x256xf32>
    %14 = tpu.matmul %13, %5, %cst_12 {dimension_numbers = #tpu.dot_dimension_numbers<[1], [1], [0], [0], [0, 0, 1, 0], [], []>} : vector<32x10xf32>, vector<256x10xf32>, vector<32x256xf32> -> vector<32x256xf32>
    %15 = arith.addf %12, %14 : vector<32x256xf32>
    %c0_13 = arith.constant 0 : index
    %c0_14 = arith.constant 0 : index
    %16 = vector.load %arg7[%c0_13, %c0_14] : memref<32x1xf32, #tpu.memory_space<vmem>>, vector<32x1xf32>
    %17 = vector.broadcast %16 : vector<32x1xf32> to vector<32x256xf32>
    %18 = arith.addf %15, %17 : vector<32x256xf32>
    %cst_15 = arith.constant 0.000000e+00 : f32
    %19 = vector.broadcast %cst_15 : f32 to vector<32x256xf32>
    %20 = arith.maximumf %18, %19 : vector<32x256xf32>
    %c0_16 = arith.constant 0 : index
    %c0_17 = arith.constant 0 : index
    %21 = vector.load %arg8[%c0_16, %c0_17] : memref<32x32xf32, #tpu.memory_space<vmem>>, vector<32x32xf32>
    %cst_18 = arith.constant dense<0.000000e+00> : vector<32x256xf32>
    %22 = tpu.matmul %21, %20, %cst_18 {dimension_numbers = #tpu.dot_dimension_numbers<[1], [0], [0], [1], [0, 0, 1, 1], [], []>} : vector<32x32xf32>, vector<32x256xf32>, vector<32x256xf32> -> vector<32x256xf32>
    %c0_19 = arith.constant 0 : index
    %c0_20 = arith.constant 0 : index
    %23 = vector.load %arg9[%c0_19, %c0_20] : memref<32x1xf32, #tpu.memory_space<vmem>>, vector<32x1xf32>
    %24 = vector.broadcast %23 : vector<32x1xf32> to vector<32x256xf32>
    %25 = arith.addf %22, %24 : vector<32x256xf32>
    %cst_21 = arith.constant 0.000000e+00 : f32
    %26 = vector.broadcast %cst_21 : f32 to vector<32x256xf32>
    %27 = arith.maximumf %25, %26 : vector<32x256xf32>
    %c0_22 = arith.constant 0 : index
    %c0_23 = arith.constant 0 : index
    %28 = vector.load %arg10[%c0_22, %c0_23] : memref<32x32xf32, #tpu.memory_space<vmem>>, vector<32x32xf32>
    %cst_24 = arith.constant dense<0.000000e+00> : vector<32x256xf32>
    %29 = tpu.matmul %28, %27, %cst_24 {dimension_numbers = #tpu.dot_dimension_numbers<[1], [0], [0], [1], [0, 0, 1, 1], [], []>} : vector<32x32xf32>, vector<32x256xf32>, vector<32x256xf32> -> vector<32x256xf32>
    %c0_25 = arith.constant 0 : index
    %c0_26 = arith.constant 0 : index
    %30 = vector.load %arg11[%c0_25, %c0_26] : memref<32x1xf32, #tpu.memory_space<vmem>>, vector<32x1xf32>
    %31 = vector.broadcast %30 : vector<32x1xf32> to vector<32x256xf32>
    %32 = arith.addf %29, %31 : vector<32x256xf32>
    %cst_27 = arith.constant 0.000000e+00 : f32
    %33 = vector.broadcast %cst_27 : f32 to vector<32x256xf32>
    %34 = arith.maximumf %32, %33 : vector<32x256xf32>
    %c0_28 = arith.constant 0 : index
    %c0_29 = arith.constant 0 : index
    %35 = vector.load %arg12[%c0_28, %c0_29] : memref<32x32xf32, #tpu.memory_space<vmem>>, vector<32x32xf32>
    %cst_30 = arith.constant dense<0.000000e+00> : vector<32x256xf32>
    %36 = tpu.matmul %35, %34, %cst_30 {dimension_numbers = #tpu.dot_dimension_numbers<[1], [0], [0], [1], [0, 0, 1, 1], [], []>} : vector<32x32xf32>, vector<32x256xf32>, vector<32x256xf32> -> vector<32x256xf32>
    %c0_31 = arith.constant 0 : index
    %c0_32 = arith.constant 0 : index
    %37 = vector.load %arg13[%c0_31, %c0_32] : memref<32x1xf32, #tpu.memory_space<vmem>>, vector<32x1xf32>
    %38 = vector.broadcast %37 : vector<32x1xf32> to vector<32x256xf32>
    %39 = arith.addf %36, %38 : vector<32x256xf32>
    %cst_33 = arith.constant 0.000000e+00 : f32
    %40 = vector.broadcast %cst_33 : f32 to vector<32x256xf32>
    %41 = arith.maximumf %39, %40 : vector<32x256xf32>
    %c0_34 = arith.constant 0 : index
    %c0_35 = arith.constant 0 : index
    %42 = vector.load %arg14[%c0_34, %c0_35] : memref<32x32xf32, #tpu.memory_space<vmem>>, vector<32x32xf32>
    %cst_36 = arith.constant dense<0.000000e+00> : vector<32x256xf32>
    %43 = tpu.matmul %42, %41, %cst_36 {dimension_numbers = #tpu.dot_dimension_numbers<[1], [0], [0], [1], [0, 0, 1, 1], [], []>} : vector<32x32xf32>, vector<32x256xf32>, vector<32x256xf32> -> vector<32x256xf32>
    %c0_37 = arith.constant 0 : index
    %c0_38 = arith.constant 0 : index
    %44 = vector.load %arg15[%c0_37, %c0_38] : memref<32x1xf32, #tpu.memory_space<vmem>>, vector<32x1xf32>
    %45 = vector.broadcast %44 : vector<32x1xf32> to vector<32x256xf32>
    %46 = arith.addf %43, %45 : vector<32x256xf32>
    %cst_39 = arith.constant 0.000000e+00 : f32
    %47 = vector.broadcast %cst_39 : f32 to vector<32x256xf32>
    %48 = arith.maximumf %46, %47 : vector<32x256xf32>
    %c0_40 = arith.constant 0 : index
    %c0_41 = arith.constant 0 : index
    %49 = vector.load %arg16[%c0_40, %c0_41] : memref<32x16xf32, #tpu.memory_space<vmem>>, vector<32x16xf32>
    %cst_42 = arith.constant dense<0.000000e+00> : vector<256x16xf32>
    %50 = tpu.matmul %48, %49, %cst_42 {dimension_numbers = #tpu.dot_dimension_numbers<[0], [0], [1], [1], [0, 1, 1, 1], [], []>} : vector<32x256xf32>, vector<32x16xf32>, vector<256x16xf32> -> vector<256x16xf32>
    %c0_43 = arith.constant 0 : index
    %c0_44 = arith.constant 0 : index
    %51 = vector.load %arg17[%c0_43, %c0_44] : memref<1x16xf32, #tpu.memory_space<vmem>>, vector<1x16xf32>
    %52 = vector.broadcast %51 : vector<1x16xf32> to vector<256x16xf32>
    %53 = arith.addf %50, %52 : vector<256x16xf32>
    %c0_45 = arith.constant 0 : index
    %c0_46 = arith.constant 0 : index
    %54 = vector.load %arg18[%c0_45, %c0_46] : memref<256x16xf32, #tpu.memory_space<vmem>>, vector<256x16xf32>
    tpu.vector_store %arg18[%c0_45, %c0_46], %53 {strides = array<i32>} : memref<256x16xf32, #tpu.memory_space<vmem>>, vector<256x16xf32>,
    return
  }
  func.func @transform_0(%arg0: i32) -> (i32, i32) {
    %c0_i32 = arith.constant 0 : i32
    %c0_i32_0 = arith.constant 0 : i32
    return %arg0, %c0_i32 : i32, i32
  }
  func.func @transform_1(%arg0: i32) -> (i32, i32) {
    %c0_i32 = arith.constant 0 : i32
    %c0_i32_0 = arith.constant 0 : i32
    return %arg0, %c0_i32 : i32, i32
  }
  func.func @transform_2(%arg0: i32) -> (i32, i32) {
    %c0_i32 = arith.constant 0 : i32
    %c0_i32_0 = arith.constant 0 : i32
    return %arg0, %c0_i32 : i32, i32
  }
  func.func @transform_3(%arg0: i32) -> (i32, i32) {
    %c0_i32 = arith.constant 0 : i32
    %c0_i32_0 = arith.constant 0 : i32
    %c0_i32_1 = arith.constant 0 : i32
    return %c0_i32, %c0_i32_0 : i32, i32
  }
  func.func @transform_4(%arg0: i32) -> (i32, i32) {
    %c0_i32 = arith.constant 0 : i32
    %c0_i32_0 = arith.constant 0 : i32
    %c0_i32_1 = arith.constant 0 : i32
    return %c0_i32, %c0_i32_0 : i32, i32
  }
  func.func @transform_5(%arg0: i32) -> (i32, i32) {
    %c0_i32 = arith.constant 0 : i32
    %c0_i32_0 = arith.constant 0 : i32
    %c0_i32_1 = arith.constant 0 : i32
    return %c0_i32, %c0_i32_0 : i32, i32
  }
  func.func @transform_6(%arg0: i32) -> (i32, i32) {
    %c0_i32 = arith.constant 0 : i32
    %c0_i32_0 = arith.constant 0 : i32
    %c0_i32_1 = arith.constant 0 : i32
    return %c0_i32, %c0_i32_0 : i32, i32
  }
  func.func @transform_7(%arg0: i32) -> (i32, i32) {
    %c0_i32 = arith.constant 0 : i32
    %c0_i32_0 = arith.constant 0 : i32
    %c0_i32_1 = arith.constant 0 : i32
    return %c0_i32, %c0_i32_0 : i32, i32
  }
  func.func @transform_8(%arg0: i32) -> (i32, i32) {
    %c0_i32 = arith.constant 0 : i32
    %c0_i32_0 = arith.constant 0 : i32
    %c0_i32_1 = arith.constant 0 : i32
    return %c0_i32, %c0_i32_0 : i32, i32
  }
  func.func @transform_9(%arg0: i32) -> (i32, i32) {
    %c0_i32 = arith.constant 0 : i32
    %c0_i32_0 = arith.constant 0 : i32
    %c0_i32_1 = arith.constant 0 : i32
    return %c0_i32, %c0_i32_0 : i32, i32
  }
  func.func @transform_10(%arg0: i32) -> (i32, i32) {
    %c0_i32 = arith.constant 0 : i32
    %c0_i32_0 = arith.constant 0 : i32
    %c0_i32_1 = arith.constant 0 : i32
    return %c0_i32, %c0_i32_0 : i32, i32
  }
  func.func @transform_11(%arg0: i32) -> (i32, i32) {
    %c0_i32 = arith.constant 0 : i32
    %c0_i32_0 = arith.constant 0 : i32
    %c0_i32_1 = arith.constant 0 : i32
    return %c0_i32, %c0_i32_0 : i32, i32
  }
  func.func @transform_12(%arg0: i32) -> (i32, i32) {
    %c0_i32 = arith.constant 0 : i32
    %c0_i32_0 = arith.constant 0 : i32
    %c0_i32_1 = arith.constant 0 : i32
    return %c0_i32, %c0_i32_0 : i32, i32
  }
  func.func @transform_13(%arg0: i32) -> (i32, i32) {
    %c0_i32 = arith.constant 0 : i32
    %c0_i32_0 = arith.constant 0 : i32
    %c0_i32_1 = arith.constant 0 : i32
    return %c0_i32, %c0_i32_0 : i32, i32
  }
  func.func @transform_14(%arg0: i32) -> (i32, i32) {
    %c0_i32 = arith.constant 0 : i32
    %c0_i32_0 = arith.constant 0 : i32
    %c0_i32_1 = arith.constant 0 : i32
    return %c0_i32, %c0_i32_0 : i32, i32
  }
  func.func @transform_15(%arg0: i32) -> (i32, i32) {
    %c0_i32 = arith.constant 0 : i32
    %c0_i32_0 = arith.constant 0 : i32
    %c0_i32_1 = arith.constant 0 : i32
    return %c0_i32, %c0_i32_0 : i32, i32
  }
  func.func @transform_16(%arg0: i32) -> (i32, i32) {
    %c0_i32 = arith.constant 0 : i32
    %c0_i32_0 = arith.constant 0 : i32
    %c0_i32_1 = arith.constant 0 : i32
    return %c0_i32, %c0_i32_0 : i32, i32
  }
  func.func @transform_17(%arg0: i32) -> (i32, i32) {
    %c0_i32 = arith.constant 0 : i32
    %c0_i32_0 = arith.constant 0 : i32
    return %arg0, %c0_i32 : i32, i32
  }
}

</mosaic_0001>

<bundles_post_ra>
// kernel: tpu_custom_call.1
= control target key start
LH: loop header
LB: loop body
LE: loop exit
PB: predicated region body
PF: predicated region fallthrough
CT: control target
= control target key end

     0   :  { %s3132_s24 = smov 0   ;;  %s3784_s0 = inlined_call_operand.vmem [shape: f32[512,16], index: 0, kind: input, shape index: {}]   ;;  %s3785_s1 = inlined_call_operand.vmem [shape: f32[512,16], index: 1, kind: input, shape index: {}]   ;;  %s3786_s2 = inlined_call_operand.vmem [shape: s32[512,1], index: 2, kind: input, shape index: {}]   ;;  %s3787_s3 = inlined_call_operand.vmem [shape: f32[32,16], index: 3, kind: input, shape index: {}]   ;;  %s3788_s4 = inlined_call_operand.vmem [shape: f32[32,16], index: 4, kind: input, shape index: {}]   ;;  %s3789_s5 = inlined_call_operand.vmem [shape: f32[32,10], index: 5, kind: input, shape index: {}]   ;;  %s3790_s6 = inlined_call_operand.vmem [shape: f32[32,1], index: 6, kind: input, shape index: {}]   ;;  %s3791_s7 = inlined_call_operand.vmem [shape: f32[32,32], index: 7, kind: input, shape index: {}]   ;;  %s3792_s8 = inlined_call_operand.vmem [shape: f32[32,1], index: 8, kind: input, shape index: {}]   ;;  %s3793_s9 = inlined_call_operand.vmem [shape: f32[32,32], index: 9, kind: input, shape index: {}]   ;;  %s3794_s10 = inlined_call_operand.vmem [shape: f32[32,1], index: 10, kind: input, shape index: {}]   ;;  %s3795_s11 = inlined_call_operand.vmem [shape: f32[32,32], index: 11, kind: input, shape index: {}]   ;;  %s3796_s12 = inlined_call_operand.vmem [shape: f32[32,1], index: 12, kind: input, shape index: {}]   ;;  %s3797_s13 = inlined_call_operand.vmem [shape: f32[32,32], index: 13, kind: input, shape index: {}]   ;;  %s3798_s14 = inlined_call_operand.vmem [shape: f32[32,1], index: 14, kind: input, shape index: {}]   ;;  %s3799_s15 = inlined_call_operand.vmem [shape: f32[32,16], index: 15, kind: input, shape index: {}]   ;;  %s3800_s16 = inlined_call_operand.vmem [shape: f32[1,16], index: 16, kind: input, shape index: {}]   ;;  %s3801_s17 = inlined_call_operand.vmem [shape: f32[512,16], index: 17, kind: output, shape index: {}]  }
   0x1   :  { %3802 = sst [smem:[#allocation2_spill]] %s3784_s0 }
   0x2   :  { %3803 = sst [smem:[#allocation3_spill]] %s3785_s1 }
   0x3 LB: > { %s2596_s25 = sadd.s32 4294967295, %s3038_s24   ;;  %p2600_p0 = scmp.ge.s32.totalorder %s3038_s24, 1  ;;  %s3038_s24 = sphi %s3132_s24, %s27_s24  }
   0x4   : > { %p510_p1 = scmp.lt.s32.totalorder %s3038_s24, 3 }
   0x6   : > { %p511_p2 = pnand %p2600_p0, %p510_p1 }
   0x7   : > { %s2601_s26 = sshll.u32 (!%p511_p2), %s2596_s25, 5  ;;  %s3804_s20 = sld [smem:[#allocation3_spill]] (!%p511_p2) }
   0x8   : > { %514 = sbr.rel (%p511_p2) target bundleno = 1670 (0x686), region = 88  ;;  %p573_p3 = scmp.lt.s32.totalorder (!%p511_p2), %s2601_s26, 63 }
   0x9   : > { %s3805_s25 = sld [smem:[#allocation2_spill]] (!%p511_p2) }
   0xd   : > { %v3040_v0 = vmov 0   ;;  %s3807_s26 = smov (!%p573_p3, %s2601_s26), 63  ;;  %vm894_vm0 = vcmask 130048   ;;  %v3151_v1 = vld [vmem:[%s3788_s4] sm:$0xff]  ;;  %vm1293_vm1 = vcmask 80896  }
   0xe   : > { %3031 = vset.pattern.permute.xlu1 %v3040_v0  ;;  %3030 = vset.pattern.permute.xlu0 %v3040_v0  ;;  %s3140_s27 = sshll.u32 %s3807_s26, 3  ;;  %v3237_v46 = vld [vmem:[%s3787_s3] sm:$0xff] }
   0xf   : > { %s3146_s0 = scalar_lea.vmem %s3786_s2, %s3140_s27  ;;  %2832 = vmatprep.mubr.msk.f32.mxu0 %vm894_vm0, %v3151_v1  ;;  %s3165_s21 = scalar_lea.vmem %s3804_s20, %s3140_s27  ;;  %2872 = vmatprep.mubr.msk.f32.mxu1 %vm894_vm0, %v3237_v46 }
  0x10   : > { %v627_v2 = vld [vmem:[%s3146_s0 + $0xf8] sm:$0xff]  ;;  %v626_v3 = vld [vmem:[%s3146_s0 + $0xf0] sm:$0xff]  ;;  %v625_v6 = vld [vmem:[%s3146_s0 + $0xe8] sm:$0xff]  ;;  %s3171_s26 = scalar_lea.vmem %s3805_s25, %s3140_s27 }
  0x11   : > { %724 = vperm.xlu0 %3030, %v627_v2   ;;  %721 = vperm.xlu1 %3031, %v626_v3   ;;  %v611_v4 = vld [vmem:[%s3146_s0 + $0x78] sm:$0xff]  ;;  %v610_v5 = vld [vmem:[%s3146_s0 + $0x70] sm:$0xff]  ;;  %v609_v7 = vld [vmem:[%s3146_s0 + $0x68] sm:$0xff] }
  0x12   : > { %v624_v8 = vld [vmem:[%s3146_s0 + $0xe0] sm:$0xff]  ;;  %v893_v10 = vld [vmem:[%s3165_s21 + $0xf8] sm:$0xff]  ;;  %v892_v14 = vld [vmem:[%s3165_s21 + $0xf0] sm:$0xff] }
  0x13   : > { %v608_v9 = vld [vmem:[%s3146_s0 + $0x60] sm:$0xff]  ;;  %2800 = vmatprep.subr.msk.mxu0 %vm894_vm0, %v893_v10  ;;  %v857_v11 = vld [vmem:[%s3171_s26 + $0xf8] sm:$0xff]  ;;  %v856_v15 = vld [vmem:[%s3171_s26 + $0xf0] sm:$0xff] }
  0x14   : > { %v877_v12 = vld [vmem:[%s3165_s21 + $0x78] sm:$0xff]  ;;  %2840 = vmatprep.subr.msk.mxu1 %vm894_vm0, %v857_v11  ;;  %v876_v16 = vld [vmem:[%s3165_s21 + $0x70] sm:$0xff]  ;;  %v891_v20 = vld [vmem:[%s3165_s21 + $0xe8] sm:$0xff] }
  0x15   : > { %676 = vperm.xlu0 %3030, %v611_v4   ;;  %673 = vperm.xlu1 %3031, %v610_v5   ;;  %v841_v13 = vld [vmem:[%s3171_s26 + $0x78] sm:$0xff]  ;;  %v840_v19 = vld [vmem:[%s3171_s26 + $0x70] sm:$0xff]  ;;  %v855_v21 = vld [vmem:[%s3171_s26 + $0xe8] sm:$0xff] }
  0x16   : > { %2801 = vmatpush3.xpose.msk.msra.mxu0 %vm894_vm0, %v877_v12  ;;  %v623_v17 = vld [vmem:[%s3146_s0 + $0xd8] sm:$0xff]  ;;  %2841 = vmatpush3.xpose.msk.msra.mxu1 %vm894_vm0, %v841_v13  ;;  %v875_v22 = vld [vmem:[%s3165_s21 + $0x68] sm:$0xff]  ;;  %v622_v23 = vld [vmem:[%s3146_s0 + $0xd0] sm:$0xff] }
  0x17   : > { %v607_v18 = vld [vmem:[%s3146_s0 + $0x58] sm:$0xff]  ;;  %2802 = vmatprep.subr.msk.mxu0 %vm894_vm0, %v892_v14  ;;  %2842 = vmatprep.subr.msk.mxu1 %vm894_vm0, %v856_v15  ;;  %v606_v24 = vld [vmem:[%s3146_s0 + $0x50] sm:$0xff]  ;;  %v839_v25 = vld [vmem:[%s3171_s26 + $0x68] sm:$0xff] }
  0x18   : > { %v890_v26 = vld [vmem:[%s3165_s21 + $0xe0] sm:$0xff]  ;;  %v621_v29 = vld [vmem:[%s3146_s0 + $0xc8] sm:$0xff]  ;;  %v889_v32 = vld [vmem:[%s3165_s21 + $0xd8] sm:$0xff] }
  0x19   : > { %718 = vperm.xlu0 %3030, %v625_v6   ;;  %670 = vperm.xlu1 %3031, %v609_v7   ;;  %v854_v27 = vld [vmem:[%s3171_s26 + $0xe0] sm:$0xff]  ;;  %v605_v30 = vld [vmem:[%s3146_s0 + $0x48] sm:$0xff]  ;;  %v853_v33 = vld [vmem:[%s3171_s26 + $0xd8] sm:$0xff] }
  0x1a   : > { %2803 = vmatpush3.xpose.msk.msra.mxu0 %vm894_vm0, %v876_v16  ;;  %2843 = vmatpush3.xpose.msk.msra.mxu1 %vm894_vm0, %v840_v19  ;;  %v874_v28 = vld [vmem:[%s3165_s21 + $0x60] sm:$0xff]  ;;  %v873_v34 = vld [vmem:[%s3165_s21 + $0x58] sm:$0xff]  ;;  %v888_v38 = vld [vmem:[%s3165_s21 + $0xd0] sm:$0xff] }
  0x1b   : > { %2804 = vmatprep.subr.msk.mxu0 %vm894_vm0, %v891_v20  ;;  %2844 = vmatprep.subr.msk.mxu1 %vm894_vm0, %v855_v21  ;;  %v838_v31 = vld [vmem:[%s3171_s26 + $0x60] sm:$0xff]  ;;  %v837_v37 = vld [vmem:[%s3171_s26 + $0x58] sm:$0xff]  ;;  %v852_v39 = vld [vmem:[%s3171_s26 + $0xd0] sm:$0xff] }
  0x1c   : > { %v620_v35 = vld [vmem:[%s3146_s0 + $0xc0] sm:$0xff]  ;;  %v872_v40 = vld [vmem:[%s3165_s21 + $0x50] sm:$0xff]  ;;  %v619_v41 = vld [vmem:[%s3146_s0 + $0xb8] sm:$0xff] }
  0x1d   : > { %715 = vperm.xlu0 %3030, %v624_v8   ;;  %667 = vperm.xlu1 %3031, %v608_v9   ;;  %v604_v36 = vld [vmem:[%s3146_s0 + $0x40] sm:$0xff]  ;;  %v603_v42 = vld [vmem:[%s3146_s0 + $0x38] sm:$0xff]  ;;  %v836_v43 = vld [vmem:[%s3171_s26 + $0x50] sm:$0xff] }
  0x1e   : > { %2805 = vmatpush3.xpose.msk.msra.mxu0 %vm894_vm0, %v875_v22  ;;  %2845 = vmatpush3.xpose.msk.msra.mxu1 %vm894_vm0, %v839_v25  ;;  %v887_v44 = vld [vmem:[%s3165_s21 + $0xc8] sm:$0xff]  ;;  %v618_v48 = vld [vmem:[%s3146_s0 + $0xb0] sm:$0xff]  ;;  %v886_v51 = vld [vmem:[%s3165_s21 + $0xc0] sm:$0xff] }
  0x1f   : > { %2806 = vmatprep.subr.msk.mxu0 %vm894_vm0, %v890_v26  ;;  %2846 = vmatprep.subr.msk.mxu1 %vm894_vm0, %v854_v27  ;;  %v851_v45 = vld [vmem:[%s3171_s26 + $0xc8] sm:$0xff]  ;;  %v602_v49 = vld [vmem:[%s3146_s0 + $0x30] sm:$0xff]  ;;  %v850_v52 = vld [vmem:[%s3171_s26 + $0xc0] sm:$0xff] }
  0x20   : > { %v871_v47 = vld [vmem:[%s3165_s21 + $0x48] sm:$0xff]  ;;  %v870_v53 = vld [vmem:[%s3165_s21 + $0x40] sm:$0xff]  ;;  %v885_v57 = vld [vmem:[%s3165_s21 + $0xb8] sm:$0xff] }
  0x21   : > { %712 = vperm.xlu0 %3030, %v623_v17   ;;  %664 = vperm.xlu1 %3031, %v607_v18   ;;  %v835_v50 = vld [vmem:[%s3171_s26 + $0x48] sm:$0xff]  ;;  %v834_v56 = vld [vmem:[%s3171_s26 + $0x40] sm:$0xff]  ;;  %v849_v58 = vld [vmem:[%s3171_s26 + $0xb8] sm:$0xff] }
  0x22   : > { %2807 = vmatpush3.xpose.msk.msra.mxu0 %vm894_vm0, %v874_v28  ;;  %2847 = vmatpush3.xpose.msk.msra.mxu1 %vm894_vm0, %v838_v31  ;;  %v617_v54 = vld [vmem:[%s3146_s0 + $0xa8] sm:$0xff]  ;;  %v869_v59 = vld [vmem:[%s3165_s21 + $0x38] sm:$0xff]  ;;  %v616_v60 = vld [vmem:[%s3146_s0 + $0xa0] sm:$0xff] }
  0x23   : > { %2808 = vmatprep.subr.msk.mxu0 %vm894_vm0, %v889_v32  ;;  %2848 = vmatprep.subr.msk.mxu1 %vm894_vm0, %v853_v33  ;;  %v601_v55 = vld [vmem:[%s3146_s0 + $0x28] sm:$0xff]  ;;  %v600_v61 = vld [vmem:[%s3146_s0 + $0x20] sm:$0xff]  ;;  %v833_v62 = vld [vmem:[%s3171_s26 + $0x38] sm:$0xff] }
  0x24   : > { %v884_v63 = vld [vmem:[%s3165_s21 + $0xb0] sm:$0xff]  ;;  %v615_v3 = vld [vmem:[%s3146_s0 + $0x98] sm:$0xff]  ;;  %v883_v6 = vld [vmem:[%s3165_s21 + $0xa8] sm:$0xff] }
  0x25   : > { %709 = vperm.xlu0 %3030, %v622_v23   ;;  %661 = vperm.xlu1 %3031, %v606_v24   ;;  %v848_v0 = vld [vmem:[%s3171_s26 + $0xb0] sm:$0xff]  ;;  %v599_v4 = vld [vmem:[%s3146_s0 + $0x18] sm:$0xff]  ;;  %v847_v7 = vld [vmem:[%s3171_s26 + $0xa8] sm:$0xff] }
  0x26   : > { %2809 = vmatpush3.xpose.msk.msra.mxu0 %vm894_vm0, %v873_v34  ;;  %2849 = vmatpush3.xpose.msk.msra.mxu1 %vm894_vm0, %v837_v37  ;;  %v868_v2 = vld [vmem:[%s3165_s21 + $0x30] sm:$0xff]  ;;  %v867_v8 = vld [vmem:[%s3165_s21 + $0x28] sm:$0xff]  ;;  %v882_v12 = vld [vmem:[%s3165_s21 + $0xa0] sm:$0xff] }
  0x27   : > { %2810 = vmatprep.subr.msk.mxu0 %vm894_vm0, %v888_v38  ;;  %2850 = vmatprep.subr.msk.mxu1 %vm894_vm0, %v852_v39  ;;  %v832_v5 = vld [vmem:[%s3171_s26 + $0x30] sm:$0xff]  ;;  %v831_v11 = vld [vmem:[%s3171_s26 + $0x28] sm:$0xff]  ;;  %v846_v13 = vld [vmem:[%s3171_s26 + $0xa0] sm:$0xff] }
  0x28   : > { %v614_v9 = vld [vmem:[%s3146_s0 + $0x90] sm:$0xff]  ;;  %v866_v14 = vld [vmem:[%s3165_s21 + $0x20] sm:$0xff]  ;;  %v613_v15 = vld [vmem:[%s3146_s0 + $0x88] sm:$0xff] }
  0x29   : > { %706 = vperm.xlu0 %3030, %v621_v29   ;;  %658 = vperm.xlu1 %3031, %v605_v30   ;;  %v598_v10 = vld [vmem:[%s3146_s0 + $0x10] sm:$0xff]  ;;  %v597_v16 = vld [vmem:[%s3146_s0 + $0x8] sm:$0xff]  ;;  %v830_v17 = vld [vmem:[%s3171_s26 + $0x20] sm:$0xff] }
  0x2a   : > { %2811 = vmatpush3.xpose.msk.msra.mxu0 %vm894_vm0, %v872_v40  ;;  %2851 = vmatpush3.xpose.msk.msra.mxu1 %vm894_vm0, %v836_v43  ;;  %v881_v18 = vld [vmem:[%s3165_s21 + $0x98] sm:$0xff]  ;;  %v612_v21 = vld [vmem:[%s3146_s0 + $0x80] sm:$0xff]  ;;  %v880_v24 = vld [vmem:[%s3165_s21 + $0x90] sm:$0xff] }
  0x2b   : > { %2812 = vmatprep.subr.msk.mxu0 %vm894_vm0, %v887_v44  ;;  %2852 = vmatprep.subr.msk.mxu1 %vm894_vm0, %v851_v45  ;;  %v845_v19 = vld [vmem:[%s3171_s26 + $0x98] sm:$0xff]  ;;  %v596_v22 = vld [vmem:[%s3146_s0] sm:$0xff]  ;;  %v844_v25 = vld [vmem:[%s3171_s26 + $0x90] sm:$0xff]  ;;  %s3683_s0 = scalar_lea.vmem %s3801_s17, %s3140_s27 }
  0x2c   : > { %v865_v20 = vld [vmem:[%s3165_s21 + $0x18] sm:$0xff]  ;;  %v864_v26 = vld [vmem:[%s3165_s21 + $0x10] sm:$0xff]  ;;  %v879_v30 = vld [vmem:[%s3165_s21 + $0x88] sm:$0xff] }
  0x2d   : > { %703 = vperm.xlu0 %3030, %v620_v35   ;;  %655 = vperm.xlu1 %3031, %v604_v36   ;;  %v829_v23 = vld [vmem:[%s3171_s26 + $0x18] sm:$0xff]  ;;  %v1501_v28 = vld [vmem:[%s3790_s6 + $0x10] sm:$0xff]  ;;  %v843_v31 = vld [vmem:[%s3171_s26 + $0x88] sm:$0xff] }
  0x2e   : > { %2813 = vmatpush3.xpose.msk.msra.mxu0 %vm894_vm0, %v871_v47  ;;  %2853 = vmatpush3.xpose.msk.msra.mxu1 %vm894_vm0, %v835_v50  ;;  %v1502_v27 = vld [vmem:[%s3790_s6 + $0x18] sm:$0xff]  ;;  %v828_v29 = vld [vmem:[%s3171_s26 + $0x10] sm:$0xff]  ;;  %v863_v32 = vld [vmem:[%s3165_s21 + $0x8] sm:$0xff] }
  0x2f   : > { %2814 = vmatprep.subr.msk.mxu0 %vm894_vm0, %v886_v51  ;;  %2854 = vmatprep.subr.msk.mxu1 %vm894_vm0, %v850_v52  ;;  %v1500_v33 = vld [vmem:[%s3790_s6 + $0x8] sm:$0xff]  ;;  %v1499_v34 = vld [vmem:[%s3790_s6] sm:$0xff]  ;;  %v1546_v39 = vld [vmem:[%s3792_s8 + $0x18] sm:$0xff] }
  0x30   : > { %v827_v35 = vld [vmem:[%s3171_s26 + $0x8] sm:$0xff]  ;;  %v878_v36 = vld [vmem:[%s3165_s21 + $0x80] sm:$0xff]  ;;  %v1545_v40 = vld [vmem:[%s3792_s8 + $0x10] sm:$0xff] }
  0x31   : > { %700 = vperm.xlu0 %3030, %v619_v41   ;;  %652 = vperm.xlu1 %3031, %v603_v42   ;;  %v842_v37 = vld [vmem:[%s3171_s26 + $0x80] sm:$0xff]  ;;  %v859_v42 = vld [vmem:[%s3788_s4 + $0x8] sm:$0xff]  ;;  %v860_v47 = vld [vmem:[%s3788_s4 + $0x10] sm:$0xff] }
  0x32   : > { %2815 = vmatpush3.xpose.msk.msra.mxu0 %vm894_vm0, %v870_v53  ;;  %2855 = vmatpush3.xpose.msk.msra.mxu1 %vm894_vm0, %v834_v56  ;;  %v862_v38 = vld [vmem:[%s3165_s21] sm:$0xff]  ;;  %v1544_v43 = vld [vmem:[%s3792_s8 + $0x8] sm:$0xff]  ;;  %v861_v50 = vld [vmem:[%s3788_s4 + $0x18] sm:$0xff] }
  0x33   : > { %2816 = vmatprep.subr.msk.mxu0 %vm894_vm0, %v885_v57  ;;  %2856 = vmatprep.subr.msk.mxu1 %vm894_vm0, %v849_v58  ;;  %v826_v41 = vld [vmem:[%s3171_s26] sm:$0xff]  ;;  %v823_v45 = vld [vmem:[%s3787_s3 + $0x8] sm:$0xff]  ;;  %v825_v52 = vld [vmem:[%s3787_s3 + $0x18] sm:$0xff]  ;;  %v3041_v58 = vmov 0.0  }
  0x34   : > { %v1543_v44 = vld [vmem:[%s3792_s8] sm:$0xff]  ;;  %v1819_v56 = vld [vmem:[%s3796_s12 + $0x8] sm:$0xff] }
  0x35   : > { %697 = vperm.xlu0 %3030, %v618_v48   ;;  %649 = vperm.xlu1 %3031, %v602_v49   ;;  %v1684_v48 = vld [vmem:[%s3794_s10 + $0x18] sm:$0xff]  ;;  %v824_v49 = vld [vmem:[%s3787_s3 + $0x10] sm:$0xff]  ;;  %v1681_v51 = vld [vmem:[%s3794_s10] sm:$0xff] }
  0x36   : > { %2817 = vmatpush3.xpose.msk.msra.mxu0 %vm894_vm0, %v869_v59  ;;  %2857 = vmatpush3.xpose.msk.msra.mxu1 %vm894_vm0, %v833_v62  ;;  %v3403_v53 = vld [vmem:[%s3789_s5] sm:$0xff]  ;;  %v1958_v62 = vld [vmem:[%s3798_s14 + $0x18] sm:$0xff] }
  0x37   : > { %2818 = vmatprep.subr.msk.mxu0 %vm894_vm0, %v884_v63  ;;  %2858 = vmatprep.subr.msk.mxu1 %vm894_vm0, %v848_v0  ;;  %v1818_v57 = vld [vmem:[%s3796_s12] sm:$0xff]  ;;  %v628_v63 = vlaneseq }
  0x38   : > { %v1955_v59 = vld [vmem:[%s3798_s14] sm:$0xff] }
  0x39   : > { %694 = vperm.xlu0 %3030, %v617_v54   ;;  %646 = vperm.xlu1 %3031, %v601_v55   ;;  %v1821_v54 = vld [vmem:[%s3796_s12 + $0x18] sm:$0xff]  ;;  %v1820_v55 = vld [vmem:[%s3796_s12 + $0x10] sm:$0xff]  ;;  %v3436_v0 = vand.u32 127, %v628_v63 }
  0x3a   : > { %2819 = vmatpush3.xpose.msk.msra.mxu0 %vm894_vm0, %v868_v2  ;;  %2859 = vmatpush3.xpose.msk.msra.mxu1 %vm894_vm0, %v832_v5 }
  0x3b   : > { %2820 = vmatprep.subr.msk.mxu0 %vm894_vm0, %v883_v6  ;;  %2860 = vmatprep.subr.msk.mxu1 %vm894_vm0, %v847_v7 }
  0x3d   : > { %691 = vperm.xlu0 %3030, %v616_v60   ;;  %643 = vperm.xlu1 %3031, %v600_v61   ;;  %v1956_v60 = vld [vmem:[%s3798_s14 + $0x8] sm:$0xff]  ;;  %v1957_v61 = vld [vmem:[%s3798_s14 + $0x10] sm:$0xff] }
  0x3e   : > { %2821 = vmatpush3.xpose.msk.msra.mxu0 %vm894_vm0, %v867_v8  ;;  %2861 = vmatpush3.xpose.msk.msra.mxu1 %vm894_vm0, %v831_v11 }
  0x3f   : > { %2822 = vmatprep.subr.msk.mxu0 %vm894_vm0, %v882_v12  ;;  %2862 = vmatprep.subr.msk.mxu1 %vm894_vm0, %v846_v13 }
  0x41   : > { %688 = vperm.xlu0 %3030, %v615_v3   ;;  %640 = vperm.xlu1 %3031, %v599_v4  }
  0x42   : > { %2823 = vmatpush3.xpose.msk.msra.mxu0 %vm894_vm0, %v866_v14  ;;  %2863 = vmatpush3.xpose.msk.msra.mxu1 %vm894_vm0, %v830_v17 }
  0x43   : > { %2824 = vmatprep.subr.msk.mxu0 %vm894_vm0, %v881_v18  ;;  %2864 = vmatprep.subr.msk.mxu1 %vm894_vm0, %v845_v19 }
  0x45   : > { %685 = vperm.xlu0 %3030, %v614_v9   ;;  %637 = vperm.xlu1 %3031, %v598_v10  }
  0x46   : > { %2825 = vmatpush3.xpose.msk.msra.mxu0 %vm894_vm0, %v865_v20  ;;  %2865 = vmatpush3.xpose.msk.msra.mxu1 %vm894_vm0, %v829_v23 }
  0x47   : > { %2826 = vmatprep.subr.msk.mxu0 %vm894_vm0, %v880_v24  ;;  %2866 = vmatprep.subr.msk.mxu1 %vm894_vm0, %v844_v25 }
  0x49   : > { %682 = vperm.xlu0 %3030, %v613_v15   ;;  %634 = vperm.xlu1 %3031, %v597_v16  }
  0x4a   : > { %2827 = vmatpush3.xpose.msk.msra.mxu0 %vm894_vm0, %v864_v26  ;;  %2867 = vmatpush3.xpose.msk.msra.mxu1 %vm894_vm0, %v828_v29 }
  0x4b   : > { %2828 = vmatprep.subr.msk.mxu0 %vm894_vm0, %v879_v30  ;;  %2868 = vmatprep.subr.msk.mxu1 %vm894_vm0, %v843_v31 }
  0x4d   : > { %679 = vperm.xlu0 %3030, %v612_v21   ;;  %631 = vperm.xlu1 %3031, %v596_v22  }
  0x4e   : > { %2829 = vmatpush3.xpose.msk.msra.mxu0 %vm894_vm0, %v863_v32  ;;  %2869 = vmatpush3.xpose.msk.msra.mxu1 %vm894_vm0, %v827_v35 }
  0x4f   : > { %2830 = vmatprep.subr.msk.mxu0 %vm894_vm0, %v878_v36  ;;  %2870 = vmatprep.subr.msk.mxu1 %vm894_vm0, %v842_v37 }
  0x51   : > { %1520 = vperm.xlu0 %3030, %v1502_v27   ;;  %1515 = vperm.xlu1 %3031, %v1501_v28  }
  0x52   : > { %2831 = vmatpush3.xpose.msk.msra.mxu0 %vm894_vm0, %v862_v38  ;;  %2871 = vmatpush3.xpose.msk.msra.mxu1 %vm894_vm0, %v826_v41 }
  0x55   : > { %1510 = vperm.xlu0 %3030, %v1500_v33   ;;  %1505 = vperm.xlu1 %3031, %v1499_v34  }
  0x56   : > { %2833 = vmatmul.mubr.msk.f32.vlgmr.msra.gmra.mxu0 %vm894_vm0, %v3151_v1  ;;  %v1683_v1 = vld [vmem:[%s3794_s10 + $0x10] sm:$0xff]  ;;  %2873 = vmatmul.mubr.msk.f32.vlgmr.msra.gmra.mxu1 %vm894_vm0, %v3237_v46  ;;  %v1682_v46 = vld [vmem:[%s3794_s10 + $0x8] sm:$0xff] }
  0x57   : > { %2834 = vmatprep.mubr.msk.f32.mxu0 %vm894_vm0, %v859_v42  ;;  %2874 = vmatprep.mubr.msk.f32.mxu1 %vm894_vm0, %v823_v45 }
  0x59   : > { %1564 = vperm.xlu0 %3030, %v1546_v39   ;;  %1559 = vperm.xlu1 %3031, %v1545_v40  }
  0x5a   : > { %2835 = vmatmul.mubr.msk.f32.gmra.mxu0 %vm894_vm0, %v859_v42  ;;  %2875 = vmatmul.mubr.msk.f32.gmra.mxu1 %vm894_vm0, %v823_v45 }
  0x5b   : > { %2836 = vmatprep.mubr.msk.f32.mxu0 %vm894_vm0, %v860_v47  ;;  %2876 = vmatprep.mubr.msk.f32.mxu1 %vm894_vm0, %v824_v49 }
  0x5d   : > { %1554 = vperm.xlu0 %3030, %v1544_v43   ;;  %1549 = vperm.xlu1 %3031, %v1543_v44  }
  0x5e   : > { %2837 = vmatmul.mubr.msk.f32.gmra.mxu0 %vm894_vm0, %v860_v47  ;;  %2877 = vmatmul.mubr.msk.f32.gmra.mxu1 %vm894_vm0, %v824_v49 }
  0x5f   : > { %2838 = vmatprep.mubr.msk.f32.mxu0 %vm894_vm0, %v861_v50  ;;  %2878 = vmatprep.mubr.msk.f32.mxu1 %vm894_vm0, %v825_v52 }
  0x61   : > { %1702 = vperm.xlu0 %3030, %v1684_v48   ;;  %1697 = vperm.xlu1 %3031, %v1683_v1  }
  0x62   : > { %2839 = vmatmul.mubr.msk.f32.gmra.mxu0 %vm894_vm0, %v861_v50  ;;  %2879 = vmatmul.mubr.msk.f32.gmra.mxu1 %vm894_vm0, %v825_v52 }
  0x63   : > { %2912 = vmatprep.mubr.msk.f32.mxu0 %vm1293_vm1, %v3403_v53  ;;  %1644 = vmatprep.mubr.f32.mxu1 %v3041_v58 }
  0x65   : > { %1692 = vperm.xlu0 %3030, %v1682_v46   ;;  %1687 = vperm.xlu1 %3031, %v1681_v51  }
  0x69   : > { %1839 = vperm.xlu0 %3030, %v1821_v54   ;;  %1834 = vperm.xlu1 %3031, %v1820_v55  }
  0x6d   : > { %1829 = vperm.xlu0 %3030, %v1819_v56   ;;  %1824 = vperm.xlu1 %3031, %v1818_v57  }
  0x71   : > { %1961 = vperm.xlu0 %3030, %v1955_v59   ;;  %1966 = vperm.xlu1 %3031, %v1956_v60  }
  0x75   : > { %1971 = vperm.xlu0 %3030, %v1957_v61   ;;  %1976 = vperm.xlu1 %3031, %v1958_v62  }
  0x8c   : > { %v725_v2 = vpop.permute.xlu0 %724  ;;  %v722_v3 = vpop.permute.xlu1 %721 }
  0x8d   : > { %vm757_vm2 = vcmp.eq.s32.totalorder %v725_v2, %v3436_v0  ;;  %vm756_vm3 = vcmp.eq.s32.totalorder %v722_v3, %v3436_v0 }
  0x8e   : > { %v2640_v4 = vsel %vm757_vm2, 1.0, %v3041_v58  ;;  %v2639_v7 = vsel %vm756_vm3, 1.0, %v3041_v58 }
  0x8f   : > { %2880 = vmatprep.subr.msk.mxu0 %vm1293_vm1, %v2640_v4 }
  0x90   : > { %v677_v5 = vpop.permute.xlu0 %676  ;;  %v674_v6 = vpop.permute.xlu1 %673 }
  0x91   : > { %vm741_vm4 = vcmp.eq.s32.totalorder %v677_v5, %v3436_v0  ;;  %vm740_vm5 = vcmp.eq.s32.totalorder %v674_v6, %v3436_v0  ;;  %v1290_v5 = vld [vmem:[%s3789_s5 + $0x8] sm:$0xff]  ;;  %v1292_v6 = vld [vmem:[%s3789_s5 + $0x18] sm:$0xff] }
  0x92   : > { %v2624_v8 = vsel %vm741_vm4, 1.0, %v3041_v58  ;;  %v2623_v11 = vsel %vm740_vm5, 1.0, %v3041_v58 }
  0x93   : > { %2881 = vmatpush3.xpose.msk.msra.mxu0 %vm1293_vm1, %v2624_v8 }
  0x94   : > { %v719_v9 = vpop.permute.xlu0 %718  ;;  %v671_v10 = vpop.permute.xlu1 %670  ;;  %2882 = vmatprep.subr.msk.mxu0 %vm1293_vm1, %v2639_v7 }
  0x95   : > { %vm755_vm6 = vcmp.eq.s32.totalorder %v719_v9, %v3436_v0  ;;  %vm739_vm7 = vcmp.eq.s32.totalorder %v671_v10, %v3436_v0 }
  0x96   : > { %v2638_v12 = vsel %vm755_vm6, 1.0, %v3041_v58  ;;  %v2622_v15 = vsel %vm739_vm7, 1.0, %v3041_v58 }
  0x97   : > { %2883 = vmatpush3.xpose.msk.msra.mxu0 %vm1293_vm1, %v2623_v11 }
  0x98   : > { %v716_v13 = vpop.permute.xlu0 %715  ;;  %v668_v14 = vpop.permute.xlu1 %667  ;;  %2884 = vmatprep.subr.msk.mxu0 %vm1293_vm1, %v2638_v12 }
  0x99   : > { %vm754_vm8 = vcmp.eq.s32.totalorder %v716_v13, %v3436_v0  ;;  %vm738_vm9 = vcmp.eq.s32.totalorder %v668_v14, %v3436_v0 }
  0x9a   : > { %v2637_v16 = vsel %vm754_vm8, 1.0, %v3041_v58  ;;  %v2621_v19 = vsel %vm738_vm9, 1.0, %v3041_v58 }
  0x9b   : > { %2885 = vmatpush3.xpose.msk.msra.mxu0 %vm1293_vm1, %v2622_v15 }
  0x9c   : > { %v713_v17 = vpop.permute.xlu0 %712  ;;  %v665_v18 = vpop.permute.xlu1 %664  ;;  %2886 = vmatprep.subr.msk.mxu0 %vm1293_vm1, %v2637_v16 }
  0x9d   : > { %vm753_vm10 = vcmp.eq.s32.totalorder %v713_v17, %v3436_v0  ;;  %vm737_vm11 = vcmp.eq.s32.totalorder %v665_v18, %v3436_v0 }
  0x9e   : > { %v2636_v20 = vsel %vm753_vm10, 1.0, %v3041_v58  ;;  %v2620_v23 = vsel %vm737_vm11, 1.0, %v3041_v58 }
  0x9f   : > { %2887 = vmatpush3.xpose.msk.msra.mxu0 %vm1293_vm1, %v2621_v19 }
  0xa0   : > { %v710_v21 = vpop.permute.xlu0 %709  ;;  %v662_v22 = vpop.permute.xlu1 %661  ;;  %2888 = vmatprep.subr.msk.mxu0 %vm1293_vm1, %v2636_v20 }
  0xa1   : > { %vm752_vm12 = vcmp.eq.s32.totalorder %v710_v21, %v3436_v0  ;;  %vm736_vm13 = vcmp.eq.s32.totalorder %v662_v22, %v3436_v0 }
  0xa2   : > { %v2635_v24 = vsel %vm752_vm12, 1.0, %v3041_v58  ;;  %v2619_v27 = vsel %vm736_vm13, 1.0, %v3041_v58 }
  0xa3   : > { %2889 = vmatpush3.xpose.msk.msra.mxu0 %vm1293_vm1, %v2620_v23 }
  0xa4   : > { %v707_v25 = vpop.permute.xlu0 %706  ;;  %v659_v26 = vpop.permute.xlu1 %658  ;;  %2890 = vmatprep.subr.msk.mxu0 %vm1293_vm1, %v2635_v24 }
  0xa5   : > { %vm751_vm14 = vcmp.eq.s32.totalorder %v707_v25, %v3436_v0  ;;  %vm735_vm15 = vcmp.eq.s32.totalorder %v659_v26, %v3436_v0 }
  0xa6   : > { %v2634_v28 = vsel %vm751_vm14, 1.0, %v3041_v58  ;;  %v2618_v31 = vsel %vm735_vm15, 1.0, %v3041_v58 }
  0xa7   : > { %2891 = vmatpush3.xpose.msk.msra.mxu0 %vm1293_vm1, %v2619_v27 }
  0xa8   : > { %v704_v29 = vpop.permute.xlu0 %703  ;;  %v656_v30 = vpop.permute.xlu1 %655  ;;  %2892 = vmatprep.subr.msk.mxu0 %vm1293_vm1, %v2634_v28 }
  0xa9   : > { %vm750_vm2 = vcmp.eq.s32.totalorder %v704_v29, %v3436_v0  ;;  %vm734_vm3 = vcmp.eq.s32.totalorder %v656_v30, %v3436_v0 }
  0xaa   : > { %v2633_v32 = vsel %vm750_vm2, 1.0, %v3041_v58  ;;  %v2617_v35 = vsel %vm734_vm3, 1.0, %v3041_v58 }
  0xab   : > { %2893 = vmatpush3.xpose.msk.msra.mxu0 %vm1293_vm1, %v2618_v31 }
  0xac   : > { %v701_v33 = vpop.permute.xlu0 %700  ;;  %v653_v34 = vpop.permute.xlu1 %652  ;;  %2894 = vmatprep.subr.msk.mxu0 %vm1293_vm1, %v2633_v32 }
  0xad   : > { %vm749_vm4 = vcmp.eq.s32.totalorder %v701_v33, %v3436_v0  ;;  %vm733_vm5 = vcmp.eq.s32.totalorder %v653_v34, %v3436_v0 }
  0xae   : > { %v2632_v36 = vsel %vm749_vm4, 1.0, %v3041_v58  ;;  %v2616_v39 = vsel %vm733_vm5, 1.0, %v3041_v58 }
  0xaf   : > { %2895 = vmatpush3.xpose.msk.msra.mxu0 %vm1293_vm1, %v2617_v35 }
  0xb0   : > { %v698_v37 = vpop.permute.xlu0 %697  ;;  %v650_v38 = vpop.permute.xlu1 %649  ;;  %2896 = vmatprep.subr.msk.mxu0 %vm1293_vm1, %v2632_v36 }
  0xb1   : > { %vm748_vm6 = vcmp.eq.s32.totalorder %v698_v37, %v3436_v0  ;;  %vm732_vm7 = vcmp.eq.s32.totalorder %v650_v38, %v3436_v0 }
  0xb2   : > { %v2631_v40 = vsel %vm748_vm6, 1.0, %v3041_v58  ;;  %v2615_v43 = vsel %vm732_vm7, 1.0, %v3041_v58 }
  0xb3   : > { %2897 = vmatpush3.xpose.msk.msra.mxu0 %vm1293_vm1, %v2616_v39 }
  0xb4   : > { %v695_v41 = vpop.permute.xlu0 %694  ;;  %v647_v42 = vpop.permute.xlu1 %646  ;;  %2898 = vmatprep.subr.msk.mxu0 %vm1293_vm1, %v2631_v40 }
  0xb5   : > { %vm747_vm8 = vcmp.eq.s32.totalorder %v695_v41, %v3436_v0  ;;  %vm731_vm9 = vcmp.eq.s32.totalorder %v647_v42, %v3436_v0 }
  0xb6   : > { %v2630_v44 = vsel %vm747_vm8, 1.0, %v3041_v58  ;;  %v2614_v48 = vsel %vm731_vm9, 1.0, %v3041_v58 }
  0xb7   : > { %2899 = vmatpush3.xpose.msk.msra.mxu0 %vm1293_vm1, %v2615_v43 }
  0xb8   : > { %v692_v45 = vpop.permute.xlu0 %691  ;;  %v644_v47 = vpop.permute.xlu1 %643  ;;  %2900 = vmatprep.subr.msk.mxu0 %vm1293_vm1, %v2630_v44 }
  0xb9   : > { %vm746_vm10 = vcmp.eq.s32.totalorder %v692_v45, %v3436_v0  ;;  %vm730_vm11 = vcmp.eq.s32.totalorder %v644_v47, %v3436_v0 }
  0xba   : > { %v2629_v1 = vsel %vm746_vm10, 1.0, %v3041_v58  ;;  %v2613_v46 = vsel %vm730_vm11, 1.0, %v3041_v58 }
  0xbb   : > { %2901 = vmatpush3.xpose.msk.msra.mxu0 %vm1293_vm1, %v2614_v48 }
  0xbc   : > { %v689_v49 = vpop.permute.xlu0 %688  ;;  %v641_v50 = vpop.permute.xlu1 %640  ;;  %2902 = vmatprep.subr.msk.mxu0 %vm1293_vm1, %v2629_v1 }
  0xbd   : > { %vm745_vm12 = vcmp.eq.s32.totalorder %v689_v49, %v3436_v0  ;;  %vm729_vm13 = vcmp.eq.s32.totalorder %v641_v50, %v3436_v0 }
  0xbe   : > { %v2628_v51 = vsel %vm745_vm12, 1.0, %v3041_v58  ;;  %v2612_v55 = vsel %vm729_vm13, 1.0, %v3041_v58 }
  0xbf   : > { %2903 = vmatpush3.xpose.msk.msra.mxu0 %vm1293_vm1, %v2613_v46 }
  0xc0   : > { %v686_v52 = vpop.permute.xlu0 %685  ;;  %v638_v54 = vpop.permute.xlu1 %637  ;;  %2904 = vmatprep.subr.msk.mxu0 %vm1293_vm1, %v2628_v51 }
  0xc1   : > { %vm744_vm14 = vcmp.eq.s32.totalorder %v686_v52, %v3436_v0  ;;  %vm728_vm15 = vcmp.eq.s32.totalorder %v638_v54, %v3436_v0 }
  0xc2   : > { %v2627_v56 = vsel %vm744_vm14, 1.0, %v3041_v58  ;;  %v2611_v60 = vsel %vm728_vm15, 1.0, %v3041_v58 }
  0xc3   : > { %2905 = vmatpush3.xpose.msk.msra.mxu0 %vm1293_vm1, %v2612_v55 }
  0xc4   : > { %v683_v57 = vpop.permute.xlu0 %682  ;;  %v635_v59 = vpop.permute.xlu1 %634  ;;  %2906 = vmatprep.subr.msk.mxu0 %vm1293_vm1, %v2627_v56 }
  0xc5   : > { %vm743_vm2 = vcmp.eq.s32.totalorder %v683_v57, %v3436_v0  ;;  %vm727_vm3 = vcmp.eq.s32.totalorder %v635_v59, %v3436_v0 }
  0xc6   : > { %v2626_v61 = vsel %vm743_vm2, 1.0, %v3041_v58  ;;  %v2610_v2 = vsel %vm727_vm3, 1.0, %v3041_v58 }
  0xc7   : > { %2907 = vmatpush3.xpose.msk.msra.mxu0 %vm1293_vm1, %v2611_v60 }
  0xc8   : > { %v680_v62 = vpop.permute.xlu0 %679  ;;  %v632_v63 = vpop.permute.xlu1 %631  ;;  %2908 = vmatprep.subr.msk.mxu0 %vm1293_vm1, %v2626_v61 }
  0xc9   : > { %vm742_vm4 = vcmp.eq.s32.totalorder %v680_v62, %v3436_v0  ;;  %vm726_vm5 = vcmp.eq.s32.totalorder %v632_v63, %v3436_v0  ;;  %v1291_v0 = vld [vmem:[%s3789_s5 + $0x10] sm:$0xff] }
  0xca   : > { %v2625_v3 = vsel %vm742_vm4, 1.0, %v3041_v58  ;;  %v2609_v4 = vsel %vm726_vm5, 1.0, %v3041_v58 }
  0xcb   : > { %2909 = vmatpush3.xpose.msk.msra.mxu0 %vm1293_vm1, %v2610_v2 }
  0xcc   : > { %2910 = vmatprep.subr.msk.mxu0 %vm1293_vm1, %v2625_v3  ;;  %v1521_v30 = vpop.permute.xlu0 %1520  ;;  %v1516_v37 = vpop.permute.xlu1 %1515 }
  0xcf   : > { %2911 = vmatpush3.xpose.msk.msra.mxu0 %vm1293_vm1, %v2609_v4 }
  0xd0   : > { %v1511_v50 = vpop.permute.xlu0 %1510  ;;  %v1506_v55 = vpop.permute.xlu1 %1505 }
  0xd2   : > { %2913 = vmatmul.mubr.msk.f32.vlgmr.msra.gmra.mxu0 %vm1293_vm1, %v3403_v53 }
  0xd3   : > { %2914 = vmatprep.mubr.msk.f32.mxu0 %vm1293_vm1, %v1290_v5 }
  0xd6   : > { %2915 = vmatmul.mubr.msk.f32.gmra.mxu0 %vm1293_vm1, %v1290_v5  ;;  %v1539_v5 = vld [vmem:[%s3791_s7] sm:$0xff] }
  0xd7   : > { %2916 = vmatprep.mubr.msk.f32.mxu0 %vm1293_vm1, %v1291_v0 }
  0xda   : > { %2917 = vmatmul.mubr.msk.f32.gmra.mxu0 %vm1293_vm1, %v1291_v0  ;;  %v1540_v0 = vld [vmem:[%s3791_s7 + $0x8] sm:$0xff] }
  0xdb   : > { %2918 = vmatprep.mubr.msk.f32.mxu0 %vm1293_vm1, %v1292_v6 }
  0xde   : > { %2919 = vmatmul.mubr.msk.f32.gmra.mxu0 %vm1293_vm1, %v1292_v6  ;;  %vm1567_vm1 = vcmask 261120   ;;  %v1541_v6 = vld [vmem:[%s3791_s7 + $0x10] sm:$0xff] }
 0x116   : > { %v1069_v53 = vpop.f32.mrf.mxu0  ;;  %v1266_v10 = vpop.f32.mrf.mxu1 }
 0x117   : > { %v1267_v44 = vadd.f32 %v1266_v10, %v1069_v53  ;;  %v1542_v53 = vld [vmem:[%s3791_s7 + $0x18] sm:$0xff] }
 0x118   : > { %v1071_v7 = vpop.f32.mrf.mxu0  ;;  %v1268_v12 = vpop.f32.mrf.mxu1 }
 0x119   : > { %v1269_v41 = vadd.f32 %v1268_v12, %v1071_v7  ;;  %v1565_v12 = vpop.permute.xlu0 %1564 }
 0x11a   : > { %v1075_v8 = vpop.f32.mrf.mxu0  ;;  %v1272_v13 = vpop.f32.mrf.mxu1 }
 0x11b   : > { %v1273_v38 = vadd.f32 %v1272_v13, %v1075_v8 }
 0x11c   : > { %v1077_v9 = vpop.f32.mrf.mxu0  ;;  %v1274_v15 = vpop.f32.mrf.mxu1 }
 0x11d   : > { %v1275_v33 = vadd.f32 %v1274_v15, %v1077_v9 }
 0x11e   : > { %v1081_v11 = vpop.f32.mrf.mxu0  ;;  %v1278_v17 = vpop.f32.mrf.mxu1 }
 0x11f   : > { %v1279_v31 = vadd.f32 %v1278_v17, %v1081_v11 }
 0x120   : > { %v1083_v14 = vpop.f32.mrf.mxu0  ;;  %v1280_v20 = vpop.f32.mrf.mxu1 }
 0x121   : > { %v1281_v28 = vadd.f32 %v1280_v20, %v1083_v14  ;;  %v1560_v14 = vpop.permute.xlu1 %1559  ;;  %v1555_v20 = vpop.permute.xlu0 %1554 }
 0x122   : > { %v1087_v16 = vpop.f32.mrf.mxu0  ;;  %v1284_v23 = vpop.f32.mrf.mxu1 }
 0x123   : > { %v1285_v29 = vadd.f32 %v1284_v23, %v1087_v16 }
 0x124   : > { %v1089_v18 = vpop.f32.mrf.mxu0  ;;  %v1286_v26 = vpop.f32.mrf.mxu1 }
 0x125   : > { %v1287_v34 = vadd.f32 %v1286_v26, %v1089_v18 }
 0x192   : > { %v1468_v19 = vpop.f32.mrf.mxu0 }
 0x193   : > { %v1491_v46 = vadd.f32 %v1468_v19, %v1267_v44  ;;  %v1703_v44 = vpop.permute.xlu0 %1702 }
 0x194   : > { %v1470_v21 = vpop.f32.mrf.mxu0 }
 0x195   : > { %v1492_v48 = vadd.f32 %v1470_v21, %v1269_v41  ;;  %v1523_v61 = vadd.f32 %v1506_v55, %v1491_v46 }
 0x196   : > { %v1474_v22 = vpop.f32.mrf.mxu0 }
 0x197   : > { %v1493_v45 = vadd.f32 %v1474_v22, %v1273_v38  ;;  %v1524_v59 = vadd.f32 %v1506_v55, %v1492_v48  ;;  %v1531_v4 = vmax.f32 %v1523_v61, 0.0  ;;  %v1680_v38 = vld [vmem:[%s3793_s9 + $0x18] sm:$0xff] }
 0x198   : > { %v1476_v24 = vpop.f32.mrf.mxu0 }
 0x199   : > { %v1494_v42 = vadd.f32 %v1476_v24, %v1275_v33  ;;  %v1525_v56 = vadd.f32 %v1511_v50, %v1493_v45  ;;  %v1532_v3 = vmax.f32 %v1524_v59, 0.0  ;;  %v1550_v24 = vpop.permute.xlu1 %1549 }
 0x19a   : > { %v1480_v25 = vpop.f32.mrf.mxu0 }
 0x19b   : > { %v1495_v39 = vadd.f32 %v1480_v25, %v1279_v31  ;;  %v1526_v52 = vadd.f32 %v1511_v50, %v1494_v42  ;;  %v1533_v2 = vmax.f32 %v1525_v56, 0.0 }
 0x19c   : > { %v1482_v27 = vpop.f32.mrf.mxu0 }
 0x19d   : > { %v1496_v35 = vadd.f32 %v1482_v27, %v1281_v28  ;;  %v1527_v51 = vadd.f32 %v1516_v37, %v1495_v39  ;;  %v1534_v63 = vmax.f32 %v1526_v52, 0.0 }
 0x19e   : > { %v1486_v32 = vpop.f32.mrf.mxu0 }
 0x19f   : > { %v1497_v36 = vadd.f32 %v1486_v32, %v1285_v29  ;;  %v1528_v1 = vadd.f32 %v1516_v37, %v1496_v35  ;;  %v1535_v62 = vmax.f32 %v1527_v51, 0.0  ;;  %v1677_v35 = vld [vmem:[%s3793_s9] sm:$0xff]  ;;  %v1679_v37 = vld [vmem:[%s3793_s9 + $0x10] sm:$0xff]  ;;  %v1693_v51 = vpop.permute.xlu0 %1692 }
 0x1a0   : > { %v1488_v40 = vpop.f32.mrf.mxu0 }
 0x1a1   : > { %v1498_v43 = vadd.f32 %v1488_v40, %v1287_v34  ;;  %v1529_v47 = vadd.f32 %v1521_v30, %v1497_v36  ;;  %v1536_v60 = vmax.f32 %v1528_v1, 0.0  ;;  %v1678_v36 = vld [vmem:[%s3793_s9 + $0x8] sm:$0xff] }
 0x1a3   : > { %v1530_v49 = vadd.f32 %v1521_v30, %v1498_v43  ;;  %v1537_v57 = vmax.f32 %v1529_v47, 0.0  ;;  %v1698_v47 = vpop.permute.xlu1 %1697 }
 0x1a5   : > { %v1538_v54 = vmax.f32 %v1530_v49, 0.0 }
 0x1a7   : > { %1604 = vmatprep.subr.mxu1 %v1538_v54  ;;  %v1688_v56 = vpop.permute.xlu1 %1687 }
 0x1a8   : > { %1605 = vmatpush1.msra.mxu1 %v1537_v57 }
 0x1a9   : > { %1606 = vmatprep.subr.mxu1 %v1536_v60 }
 0x1aa   : > { %1607 = vmatpush1.msra.mxu1 %v1535_v62 }
 0x1ab   : > { %1608 = vmatprep.subr.mxu1 %v1534_v63 }
 0x1ac   : > { %1609 = vmatpush1.msra.mxu1 %v1533_v2 }
 0x1ad   : > { %1610 = vmatprep.subr.mxu1 %v1532_v3 }
 0x1ae   : > { %1611 = vmatpush1.msra.mxu1 %v1531_v4 }
 0x1af   : > { %2749 = vmatmul.mubr.msk.f32.vlgmr.msra.gmra.mxu1 %vm1567_vm1, %v1539_v5 }
 0x1b0   : > { %1650 = vmatprep.mubr.f32.mxu1 %v3041_v58 }
 0x1b3   : > { %2750 = vmatmul.mubr.msk.f32.gmra.mxu1 %vm1567_vm1, %v1540_v0  ;;  %v1814_v0 = vld [vmem:[%s3795_s11] sm:$0xff] }
 0x1b4   : > { %1656 = vmatprep.mubr.f32.mxu1 %v3041_v58 }
 0x1b7   : > { %2751 = vmatmul.mubr.msk.f32.gmra.mxu1 %vm1567_vm1, %v1541_v6  ;;  %v1815_v6 = vld [vmem:[%s3795_s11 + $0x8] sm:$0xff] }
 0x1b8   : > { %1662 = vmatprep.mubr.f32.mxu1 %v3041_v58 }
 0x1bb   : > { %2752 = vmatmul.mubr.msk.f32.gmra.mxu1 %vm1567_vm1, %v1542_v53  ;;  %v1816_v53 = vld [vmem:[%s3795_s11 + $0x10] sm:$0xff] }
 0x1bc   : > { %1781 = vmatprep.mubr.f32.mxu1 %v3041_v58 }
 0x26f   : > { %v1646_v7 = vpop.f32.mrf.mxu1 }
 0x270   : > { %v1647_v29 = vadd.f32 %v1646_v7, %v1550_v24  ;;  %v1817_v7 = vld [vmem:[%s3795_s11 + $0x18] sm:$0xff] }
 0x271   : > { %v1648_v8 = vpop.f32.mrf.mxu1 }
 0x272   : > { %v1649_v27 = vadd.f32 %v1648_v8, %v1550_v24  ;;  %v1669_v34 = vmax.f32 %v1647_v29, 0.0 }
 0x273   : > { %v1652_v9 = vpop.f32.mrf.mxu1 }
 0x274   : > { %v1653_v25 = vadd.f32 %v1652_v9, %v1555_v20  ;;  %v1670_v33 = vmax.f32 %v1649_v27, 0.0 }
 0x275   : > { %v1654_v10 = vpop.f32.mrf.mxu1 }
 0x276   : > { %v1655_v22 = vadd.f32 %v1654_v10, %v1555_v20  ;;  %v1671_v32 = vmax.f32 %v1653_v25, 0.0 }
 0x277   : > { %v1658_v11 = vpop.f32.mrf.mxu1 }
 0x278   : > { %v1659_v21 = vadd.f32 %v1658_v11, %v1560_v14  ;;  %v1672_v31 = vmax.f32 %v1655_v22, 0.0 }
 0x279   : > { %v1660_v13 = vpop.f32.mrf.mxu1 }
 0x27a   : > { %v1661_v18 = vadd.f32 %v1660_v13, %v1560_v14  ;;  %v1673_v30 = vmax.f32 %v1659_v21, 0.0  ;;  %v1840_v13 = vpop.permute.xlu0 %1839 }
 0x27b   : > { %v1664_v15 = vpop.f32.mrf.mxu1 }
 0x27c   : > { %v1665_v16 = vadd.f32 %v1664_v15, %v1565_v12  ;;  %v1674_v28 = vmax.f32 %v1661_v18, 0.0  ;;  %v1835_v15 = vpop.permute.xlu1 %1834 }
 0x27d   : > { %v1666_v17 = vpop.f32.mrf.mxu1 }
 0x27e   : > { %v1667_v19 = vadd.f32 %v1666_v17, %v1565_v12  ;;  %v1675_v26 = vmax.f32 %v1665_v16, 0.0  ;;  %v1830_v21 = vpop.permute.xlu0 %1829 }
 0x280   : > { %v1676_v23 = vmax.f32 %v1667_v19, 0.0  ;;  %v1825_v25 = vpop.permute.xlu1 %1824 }
 0x282   : > { %1741 = vmatprep.subr.mxu1 %v1676_v23 }
 0x283   : > { %1742 = vmatpush1.msra.mxu1 %v1675_v26 }
 0x284   : > { %1743 = vmatprep.subr.mxu1 %v1674_v28 }
 0x285   : > { %1744 = vmatpush1.msra.mxu1 %v1673_v30 }
 0x286   : > { %1745 = vmatprep.subr.mxu1 %v1672_v31 }
 0x287   : > { %1746 = vmatpush1.msra.mxu1 %v1671_v32 }
 0x288   : > { %1747 = vmatprep.subr.mxu1 %v1670_v33 }
 0x289   : > { %1748 = vmatpush1.msra.mxu1 %v1669_v34 }
 0x28a   : > { %2753 = vmatmul.mubr.msk.f32.vlgmr.msra.gmra.mxu1 %vm1567_vm1, %v1677_v35 }
 0x28b   : > { %1787 = vmatprep.mubr.f32.mxu1 %v3041_v58 }
 0x28e   : > { %2754 = vmatmul.mubr.msk.f32.gmra.mxu1 %vm1567_vm1, %v1678_v36  ;;  %v1951_v36 = vld [vmem:[%s3797_s13] sm:$0xff] }
 0x28f   : > { %1793 = vmatprep.mubr.f32.mxu1 %v3041_v58 }
 0x292   : > { %2755 = vmatmul.mubr.msk.f32.gmra.mxu1 %vm1567_vm1, %v1679_v37  ;;  %v1952_v37 = vld [vmem:[%s3797_s13 + $0x8] sm:$0xff] }
 0x293   : > { %1799 = vmatprep.mubr.f32.mxu1 %v3041_v58 }
 0x296   : > { %2756 = vmatmul.mubr.msk.f32.gmra.mxu1 %vm1567_vm1, %v1680_v38  ;;  %v1953_v38 = vld [vmem:[%s3797_s13 + $0x10] sm:$0xff] }
 0x297   : > { %1918 = vmatprep.mubr.f32.mxu1 %v3041_v58 }
 0x34a   : > { %v1783_v39 = vpop.f32.mrf.mxu1 }
 0x34b   : > { %v1784_v62 = vadd.f32 %v1783_v39, %v1688_v56  ;;  %v1954_v39 = vld [vmem:[%s3797_s13 + $0x18] sm:$0xff] }
 0x34c   : > { %v1785_v40 = vpop.f32.mrf.mxu1 }
 0x34d   : > { %v1786_v60 = vadd.f32 %v1785_v40, %v1688_v56  ;;  %v1806_v5 = vmax.f32 %v1784_v62, 0.0  ;;  %v2091_v40 = vld [vmem:[%s3799_s15 + $0x18] sm:$0xff] }
 0x34e   : > { %v1789_v41 = vpop.f32.mrf.mxu1  ;;  %2956 = vmatprep.subr.mxu0 %v2091_v40 }
 0x34f   : > { %v1790_v57 = vadd.f32 %v1789_v41, %v1693_v51  ;;  %v1807_v4 = vmax.f32 %v1786_v60, 0.0  ;;  %v2090_v41 = vld [vmem:[%s3799_s15 + $0x10] sm:$0xff]  ;;  %2957 = vmatpush3.msra.mxu0 %v2091_v40 }
 0x350   : > { %v1791_v42 = vpop.f32.mrf.mxu1  ;;  %2958 = vmatprep.subr.mxu0 %v2090_v41 }
 0x351   : > { %v1792_v54 = vadd.f32 %v1791_v42, %v1693_v51  ;;  %v1808_v3 = vmax.f32 %v1790_v57, 0.0  ;;  %2959 = vmatpush3.msra.mxu0 %v2090_v41 }
 0x352   : > { %v1795_v43 = vpop.f32.mrf.mxu1 }
 0x353   : > { %v1796_v52 = vadd.f32 %v1795_v43, %v1698_v47  ;;  %v1809_v2 = vmax.f32 %v1792_v54, 0.0 }
 0x354   : > { %v1797_v45 = vpop.f32.mrf.mxu1 }
 0x355   : > { %v1798_v50 = vadd.f32 %v1797_v45, %v1698_v47  ;;  %v1810_v63 = vmax.f32 %v1796_v52, 0.0 }
 0x356   : > { %v1801_v48 = vpop.f32.mrf.mxu1 }
 0x357   : > { %v1802_v1 = vadd.f32 %v1801_v48, %v1703_v44  ;;  %v1811_v61 = vmax.f32 %v1798_v50, 0.0 }
 0x358   : > { %v1803_v49 = vpop.f32.mrf.mxu1 }
 0x359   : > { %v1804_v46 = vadd.f32 %v1803_v49, %v1703_v44  ;;  %v1812_v59 = vmax.f32 %v1802_v1, 0.0  ;;  %v2089_v44 = vld [vmem:[%s3799_s15 + $0x8] sm:$0xff]  ;;  %v2088_v1 = vld [vmem:[%s3799_s15] sm:$0xff]  ;;  %v1967_v49 = vpop.permute.xlu1 %1966 }
 0x35a   : > { %2960 = vmatprep.subr.mxu0 %v2089_v44 }
 0x35b   : > { %v1813_v55 = vmax.f32 %v1804_v46, 0.0  ;;  %2961 = vmatpush3.msra.mxu0 %v2089_v44 }
 0x35c   : > { %2962 = vmatprep.subr.mxu0 %v2088_v1 }
 0x35d   : > { %1878 = vmatprep.subr.mxu1 %v1813_v55  ;;  %2963 = vmatpush3.msra.mxu0 %v2088_v1 }
 0x35e   : > { %1879 = vmatpush1.msra.mxu1 %v1812_v59 }
 0x35f   : > { %1880 = vmatprep.subr.mxu1 %v1811_v61 }
 0x360   : > { %1881 = vmatpush1.msra.mxu1 %v1810_v63 }
 0x361   : > { %1882 = vmatprep.subr.mxu1 %v1809_v2  ;;  %v1977_v2 = vpop.permute.xlu1 %1976 }
 0x362   : > { %1883 = vmatpush1.msra.mxu1 %v1808_v3 }
 0x363   : > { %1884 = vmatprep.subr.mxu1 %v1807_v4 }
 0x364   : > { %1885 = vmatpush1.msra.mxu1 %v1806_v5 }
 0x365   : > { %2757 = vmatmul.mubr.msk.f32.vlgmr.msra.gmra.mxu1 %vm1567_vm1, %v1814_v0 }
 0x366   : > { %1924 = vmatprep.mubr.f32.mxu1 %v3041_v58 }
 0x369   : > { %2758 = vmatmul.mubr.msk.f32.gmra.mxu1 %vm1567_vm1, %v1815_v6 }
 0x36a   : > { %1930 = vmatprep.mubr.f32.mxu1 %v3041_v58 }
 0x36d   : > { %2759 = vmatmul.mubr.msk.f32.gmra.mxu1 %vm1567_vm1, %v1816_v53 }
 0x36e   : > { %1936 = vmatprep.mubr.f32.mxu1 %v3041_v58 }
 0x371   : > { %2760 = vmatmul.mubr.msk.f32.gmra.mxu1 %vm1567_vm1, %v1817_v7 }
 0x372   : > { %2055 = vmatprep.mubr.f32.mxu1 %v3041_v58 }
 0x425   : > { %v1920_v8 = vpop.f32.mrf.mxu1 }
 0x426   : > { %v1921_v30 = vadd.f32 %v1920_v8, %v1825_v25 }
 0x427   : > { %v1922_v9 = vpop.f32.mrf.mxu1 }
 0x428   : > { %v1923_v28 = vadd.f32 %v1922_v9, %v1825_v25  ;;  %v1943_v35 = vmax.f32 %v1921_v30, 0.0 }
 0x429   : > { %v1926_v10 = vpop.f32.mrf.mxu1 }
 0x42a   : > { %v1927_v26 = vadd.f32 %v1926_v10, %v1830_v21  ;;  %v1944_v34 = vmax.f32 %v1923_v28, 0.0 }
 0x42b   : > { %v1928_v11 = vpop.f32.mrf.mxu1 }
 0x42c   : > { %v1929_v23 = vadd.f32 %v1928_v11, %v1830_v21  ;;  %v1945_v33 = vmax.f32 %v1927_v26, 0.0 }
 0x42d   : > { %v1932_v12 = vpop.f32.mrf.mxu1 }
 0x42e   : > { %v1933_v22 = vadd.f32 %v1932_v12, %v1835_v15  ;;  %v1946_v32 = vmax.f32 %v1929_v23, 0.0 }
 0x42f   : > { %v1934_v14 = vpop.f32.mrf.mxu1 }
 0x430   : > { %v1935_v19 = vadd.f32 %v1934_v14, %v1835_v15  ;;  %v1947_v31 = vmax.f32 %v1933_v22, 0.0 }
 0x431   : > { %v1938_v16 = vpop.f32.mrf.mxu1 }
 0x432   : > { %v1939_v17 = vadd.f32 %v1938_v16, %v1840_v13  ;;  %v1948_v29 = vmax.f32 %v1935_v19, 0.0 }
 0x433   : > { %v1940_v18 = vpop.f32.mrf.mxu1 }
 0x434   : > { %v1941_v20 = vadd.f32 %v1940_v18, %v1840_v13  ;;  %v1949_v27 = vmax.f32 %v1939_v17, 0.0 }
 0x436   : > { %v1950_v24 = vmax.f32 %v1941_v20, 0.0 }
 0x438   : > { %2015 = vmatprep.subr.mxu1 %v1950_v24 }
 0x439   : > { %2016 = vmatpush1.msra.mxu1 %v1949_v27 }
 0x43a   : > { %2017 = vmatprep.subr.mxu1 %v1948_v29 }
 0x43b   : > { %2018 = vmatpush1.msra.mxu1 %v1947_v31 }
 0x43c   : > { %2019 = vmatprep.subr.mxu1 %v1946_v32 }
 0x43d   : > { %2020 = vmatpush1.msra.mxu1 %v1945_v33 }
 0x43e   : > { %2021 = vmatprep.subr.mxu1 %v1944_v34 }
 0x43f   : > { %2022 = vmatpush1.msra.mxu1 %v1943_v35 }
 0x440   : > { %2761 = vmatmul.mubr.msk.f32.vlgmr.msra.gmra.mxu1 %vm1567_vm1, %v1951_v36  ;;  %3012 = vmatprep.subr.mxu1 %v2091_v40 }
 0x441   : > { %2061 = vmatprep.mubr.f32.mxu1 %v3041_v58  ;;  %3016 = vmatpush3.msra.mxu1 %v2091_v40  ;;  %v3677_v40 = vld [vmem:[%s3800_s16] ss:$0 sm:$0xff] }
 0x442   : > { %3013 = vmatprep.subr.mxu1 %v2090_v41 }
 0x443   : > { %3017 = vmatpush3.msra.mxu1 %v2090_v41 }
 0x444   : > { %2762 = vmatmul.mubr.msk.f32.gmra.mxu1 %vm1567_vm1, %v1952_v37  ;;  %3014 = vmatprep.subr.mxu1 %v2089_v44 }
 0x445   : > { %2067 = vmatprep.mubr.f32.mxu1 %v3041_v58  ;;  %3018 = vmatpush3.msra.mxu1 %v2089_v44 }
 0x446   : > { %3015 = vmatprep.subr.mxu1 %v2088_v1 }
 0x447   : > { %3019 = vmatpush3.msra.mxu1 %v2088_v1 }
 0x448   : > { %2763 = vmatmul.mubr.msk.f32.gmra.mxu1 %vm1567_vm1, %v1953_v38 }
 0x449   : > { %2073 = vmatprep.mubr.f32.mxu1 %v3041_v58  ;;  %v1962_v58 = vpop.permute.xlu0 %1961 }
 0x44c   : > { %2764 = vmatmul.mubr.msk.f32.gmra.mxu1 %vm1567_vm1, %v1954_v39 }
 0x44d   : > { %v1972_v56 = vpop.permute.xlu0 %1971 }
 0x500   : > { %v2057_v42 = vpop.f32.mrf.mxu1 }
 0x501   : > { %v2058_v43 = vadd.f32 %v2057_v42, %v1962_v58 }
 0x502   : > { %v2059_v45 = vpop.f32.mrf.mxu1 }
 0x503   : > { %v2080_v47 = vmax.f32 %v2058_v43, 0.0  ;;  %v2060_v48 = vadd.f32 %v2059_v45, %v1962_v58 }
 0x504   : > { %v2063_v50 = vpop.f32.mrf.mxu1 }
 0x505   : > { %v2081_v46 = vmax.f32 %v2060_v48, 0.0  ;;  %v2064_v51 = vadd.f32 %v2063_v50, %v1967_v49  ;;  %2099 = vxpose.xlu0.b32.start [1/4] (short) %v2080_v47, 128 }
 0x506   : > { %v2065_v52 = vpop.f32.mrf.mxu1 }
 0x507   : > { %v2082_v54 = vmax.f32 %v2064_v51, 0.0  ;;  %v2066_v55 = vadd.f32 %v2065_v52, %v1967_v49  ;;  %2131 = vxpose.xlu1.b32.start [1/4] (short) %v2081_v46, 128 }
 0x508   : > { %v2069_v57 = vpop.f32.mrf.mxu1 }
 0x509   : > { %v2083_v59 = vmax.f32 %v2066_v55, 0.0  ;;  %v2070_v60 = vadd.f32 %v2069_v57, %v1972_v56  ;;  %2100 = vxpose.xlu0.b32.cont [2/4] (short) %v2082_v54, 128 }
 0x50a   : > { %v2071_v61 = vpop.f32.mrf.mxu1 }
 0x50b   : > { %v2084_v62 = vmax.f32 %v2070_v60, 0.0  ;;  %v2072_v63 = vadd.f32 %v2071_v61, %v1972_v56  ;;  %2132 = vxpose.xlu1.b32.cont [2/4] (short) %v2083_v59, 128 }
 0x50c   : > { %v2075_v3 = vpop.f32.mrf.mxu1 }
 0x50d   : > { %v2085_v4 = vmax.f32 %v2072_v63, 0.0  ;;  %v2076_v5 = vadd.f32 %v2075_v3, %v1977_v2  ;;  %2101 = vxpose.xlu0.b32.cont [3/4] (short) %v2084_v62, 128 }
 0x50e   : > { %v2077_v0 = vpop.f32.mrf.mxu1 }
 0x50f   : > { %v2086_v6 = vmax.f32 %v2076_v5, 0.0  ;;  %v2078_v53 = vadd.f32 %v2077_v0, %v1977_v2  ;;  %2133 = vxpose.xlu1.b32.cont [3/4] (short) %v2085_v4, 128 }
 0x511   : > { %v2087_v7 = vmax.f32 %v2078_v53, 0.0  ;;  %2102 = vxpose.xlu0.b32.end [4/4] (short) %v2086_v6, 128 }
 0x513   : > { %2134 = vxpose.xlu1.b32.end [4/4] (short) %v2087_v7, 128 }
 0x581   : > { %v2115_v8 = vpop.trf.xlu0 }
 0x582   : > { %2964 = vmatprep.mubr.msk.f32.mxu0 %vm1567_vm1, %v2115_v8 }
 0x583   : > { %v2147_v9 = vpop.trf.xlu1 }
 0x584   : > { %2988 = vmatprep.mubr.msk.f32.mxu1 %vm1567_vm1, %v2147_v9 }
 0x585   : > { %v2116_v10 = vpop.trf.xlu0 }
 0x586   : > { %2965 = vmatmul.mubr.msk.f32.vlgmr.msra.gmra.mxu0 %vm1567_vm1, %v2116_v10 }
 0x587   : > { %v2148_v11 = vpop.trf.xlu1 }
 0x588   : > { %2989 = vmatmul.mubr.msk.f32.vlgmr.msra.gmra.mxu1 %vm1567_vm1, %v2148_v11 }
 0x589   : > { %v2117_v12 = vpop.trf.xlu0 }
 0x58a   : > { %2967 = vmatprep.mubr.msk.f32.mxu0 %vm1567_vm1, %v2117_v12 }
 0x58b   : > { %v2149_v13 = vpop.trf.xlu1 }
 0x58c   : > { %2991 = vmatprep.mubr.msk.f32.mxu1 %vm1567_vm1, %v2149_v13 }
 0x58d   : > { %v2118_v14 = vpop.trf.xlu0 }
 0x58e   : > { %2968 = vmatmul.mubr.msk.f32.gmra.mxu0 %vm1567_vm1, %v2118_v14 }
 0x58f   : > { %v2150_v15 = vpop.trf.xlu1 }
 0x590   : > { %2992 = vmatmul.mubr.msk.f32.gmra.mxu1 %vm1567_vm1, %v2150_v15 }
 0x591   : > { %v2119_v16 = vpop.trf.xlu0 }
 0x592   : > { %2970 = vmatprep.mubr.msk.f32.mxu0 %vm1567_vm1, %v2119_v16 }
 0x593   : > { %v2151_v17 = vpop.trf.xlu1 }
 0x594   : > { %2994 = vmatprep.mubr.msk.f32.mxu1 %vm1567_vm1, %v2151_v17 }
 0x595   : > { %v2120_v18 = vpop.trf.xlu0 }
 0x596   : > { %2971 = vmatmul.mubr.msk.f32.gmra.mxu0 %vm1567_vm1, %v2120_v18 }
 0x597   : > { %v2152_v19 = vpop.trf.xlu1 }
 0x598   : > { %2995 = vmatmul.mubr.msk.f32.gmra.mxu1 %vm1567_vm1, %v2152_v19 }
 0x599   : > { %v2121_v20 = vpop.trf.xlu0 }
 0x59a   : > { %2973 = vmatprep.mubr.msk.f32.mxu0 %vm1567_vm1, %v2121_v20 }
 0x59b   : > { %v2153_v21 = vpop.trf.xlu1 }
 0x59c   : > { %2997 = vmatprep.mubr.msk.f32.mxu1 %vm1567_vm1, %v2153_v21 }
 0x59d   : > { %v2122_v22 = vpop.trf.xlu0 }
 0x59e   : > { %2974 = vmatmul.mubr.msk.f32.gmra.mxu0 %vm1567_vm1, %v2122_v22 }
 0x59f   : > { %v2154_v23 = vpop.trf.xlu1 }
 0x5a0   : > { %2998 = vmatmul.mubr.msk.f32.gmra.mxu1 %vm1567_vm1, %v2154_v23 }
 0x5a1   : > { %v2123_v24 = vpop.trf.xlu0 }
 0x5a2   : > { %2976 = vmatprep.mubr.msk.f32.mxu0 %vm1567_vm1, %v2123_v24 }
 0x5a3   : > { %v2155_v25 = vpop.trf.xlu1 }
 0x5a4   : > { %3000 = vmatprep.mubr.msk.f32.mxu1 %vm1567_vm1, %v2155_v25 }
 0x5a5   : > { %v2124_v26 = vpop.trf.xlu0 }
 0x5a6   : > { %2977 = vmatmul.mubr.msk.f32.gmra.mxu0 %vm1567_vm1, %v2124_v26 }
 0x5a7   : > { %v2156_v27 = vpop.trf.xlu1 }
 0x5a8   : > { %3001 = vmatmul.mubr.msk.f32.gmra.mxu1 %vm1567_vm1, %v2156_v27 }
 0x5a9   : > { %v2125_v28 = vpop.trf.xlu0 }
 0x5aa   : > { %2979 = vmatprep.mubr.msk.f32.mxu0 %vm1567_vm1, %v2125_v28 }
 0x5ab   : > { %v2157_v29 = vpop.trf.xlu1 }
 0x5ac   : > { %3003 = vmatprep.mubr.msk.f32.mxu1 %vm1567_vm1, %v2157_v29 }
 0x5ad   : > { %v2126_v30 = vpop.trf.xlu0 }
 0x5ae   : > { %2980 = vmatmul.mubr.msk.f32.gmra.mxu0 %vm1567_vm1, %v2126_v30 }
 0x5af   : > { %v2158_v31 = vpop.trf.xlu1 }
 0x5b0   : > { %3004 = vmatmul.mubr.msk.f32.gmra.mxu1 %vm1567_vm1, %v2158_v31 }
 0x5b1   : > { %v2127_v32 = vpop.trf.xlu0 }
 0x5b2   : > { %2982 = vmatprep.mubr.msk.f32.mxu0 %vm1567_vm1, %v2127_v32 }
 0x5b3   : > { %v2159_v33 = vpop.trf.xlu1 }
 0x5b4   : > { %3006 = vmatprep.mubr.msk.f32.mxu1 %vm1567_vm1, %v2159_v33 }
 0x5b5   : > { %v2128_v34 = vpop.trf.xlu0 }
 0x5b6   : > { %2983 = vmatmul.mubr.msk.f32.gmra.mxu0 %vm1567_vm1, %v2128_v34 }
 0x5b7   : > { %v2160_v35 = vpop.trf.xlu1 }
 0x5b8   : > { %3007 = vmatmul.mubr.msk.f32.gmra.mxu1 %vm1567_vm1, %v2160_v35 }
 0x5b9   : > { %v2129_v36 = vpop.trf.xlu0 }
 0x5ba   : > { %2985 = vmatprep.mubr.msk.f32.mxu0 %vm1567_vm1, %v2129_v36 }
 0x5bb   : > { %v2161_v37 = vpop.trf.xlu1 }
 0x5bc   : > { %3009 = vmatprep.mubr.msk.f32.mxu1 %vm1567_vm1, %v2161_v37 }
 0x5bd   : > { %v2130_v38 = vpop.trf.xlu0 }
 0x5be   : > { %2986 = vmatmul.mubr.msk.f32.gmra.mxu0 %vm1567_vm1, %v2130_v38 }
 0x5bf   : > { %v2162_v39 = vpop.trf.xlu1 }
 0x5c0   : > { %3010 = vmatmul.mubr.msk.f32.gmra.mxu1 %vm1567_vm1, %v2162_v39 }
 0x646   : > { %v2966_v41 = vpop.f32.mrf.mxu0 }
 0x647   : > { %v2331_v58 = vadd.f32 %v2966_v41, %v3677_v40 }
 0x648   : > { %v2990_v42 = vpop.f32.mrf.mxu1  ;;  %v2325_v43 = vpop.f32.mrf.mxu0 }
 0x649   : > { %2485 = vst.msk [vmem:[%s3683_s0 + $0x8] sm:$0xff] %vm894_vm0, %v2331_v58  ;;  %v2411_v44 = vadd.f32 %v2990_v42, %v3677_v40  ;;  %v2326_v45 = vadd.f32 %v3677_v40, %v2325_v43 }
 0x64a   : > { %v2405_v47 = vpop.f32.mrf.mxu1 }
 0x64b   : > { %2501 = vst.msk [vmem:[%s3683_s0 + $0x88] sm:$0xff] %vm894_vm0, %v2411_v44  ;;  %2484 = vst.msk [vmem:[%s3683_s0] sm:$0xff] %vm894_vm0, %v2326_v45  ;;  %v2406_v48 = vadd.f32 %v3677_v40, %v2405_v47 }
 0x64d   : > { %2500 = vst.msk [vmem:[%s3683_s0 + $0x80] sm:$0xff] %vm894_vm0, %v2406_v48 }
 0x64e   : > { %v2969_v1 = vpop.f32.mrf.mxu0 }
 0x64f   : > { %v2341_v49 = vadd.f32 %v2969_v1, %v3677_v40 }
 0x650   : > { %v2993_v50 = vpop.f32.mrf.mxu1  ;;  %v2335_v46 = vpop.f32.mrf.mxu0 }
 0x651   : > { %2487 = vst.msk [vmem:[%s3683_s0 + $0x18] sm:$0xff] %vm894_vm0, %v2341_v49  ;;  %v2421_v51 = vadd.f32 %v2993_v50, %v3677_v40  ;;  %v2336_v52 = vadd.f32 %v3677_v40, %v2335_v46 }
 0x652   : > { %v2415_v54 = vpop.f32.mrf.mxu1 }
 0x653   : > { %2503 = vst.msk [vmem:[%s3683_s0 + $0x98] sm:$0xff] %vm894_vm0, %v2421_v51  ;;  %2486 = vst.msk [vmem:[%s3683_s0 + $0x10] sm:$0xff] %vm894_vm0, %v2336_v52  ;;  %v2416_v55 = vadd.f32 %v3677_v40, %v2415_v54 }
 0x655   : > { %2502 = vst.msk [vmem:[%s3683_s0 + $0x90] sm:$0xff] %vm894_vm0, %v2416_v55 }
 0x656   : > { %v2972_v56 = vpop.f32.mrf.mxu0 }
 0x657   : > { %v2351_v57 = vadd.f32 %v2972_v56, %v3677_v40 }
 0x658   : > { %v2996_v59 = vpop.f32.mrf.mxu1  ;;  %v2345_v60 = vpop.f32.mrf.mxu0 }
 0x659   : > { %2489 = vst.msk [vmem:[%s3683_s0 + $0x28] sm:$0xff] %vm894_vm0, %v2351_v57  ;;  %v2431_v61 = vadd.f32 %v2996_v59, %v3677_v40  ;;  %v2346_v62 = vadd.f32 %v3677_v40, %v2345_v60 }
 0x65a   : > { %v2425_v63 = vpop.f32.mrf.mxu1 }
 0x65b   : > { %2505 = vst.msk [vmem:[%s3683_s0 + $0xa8] sm:$0xff] %vm894_vm0, %v2431_v61  ;;  %2488 = vst.msk [vmem:[%s3683_s0 + $0x20] sm:$0xff] %vm894_vm0, %v2346_v62  ;;  %v2426_v2 = vadd.f32 %v3677_v40, %v2425_v63 }
 0x65d   : > { %2504 = vst.msk [vmem:[%s3683_s0 + $0xa0] sm:$0xff] %vm894_vm0, %v2426_v2 }
 0x65e   : > { %v2975_v3 = vpop.f32.mrf.mxu0 }
 0x65f   : > { %v2361_v4 = vadd.f32 %v2975_v3, %v3677_v40 }
 0x660   : > { %v2999_v5 = vpop.f32.mrf.mxu1  ;;  %v2355_v0 = vpop.f32.mrf.mxu0 }
 0x661   : > { %2491 = vst.msk [vmem:[%s3683_s0 + $0x38] sm:$0xff] %vm894_vm0, %v2361_v4  ;;  %v2441_v6 = vadd.f32 %v2999_v5, %v3677_v40  ;;  %v2356_v53 = vadd.f32 %v3677_v40, %v2355_v0 }
 0x662   : > { %v2435_v7 = vpop.f32.mrf.mxu1 }
 0x663   : > { %2507 = vst.msk [vmem:[%s3683_s0 + $0xb8] sm:$0xff] %vm894_vm0, %v2441_v6  ;;  %2490 = vst.msk [vmem:[%s3683_s0 + $0x30] sm:$0xff] %vm894_vm0, %v2356_v53  ;;  %v2436_v8 = vadd.f32 %v3677_v40, %v2435_v7 }
 0x665   : > { %2506 = vst.msk [vmem:[%s3683_s0 + $0xb0] sm:$0xff] %vm894_vm0, %v2436_v8 }
 0x666   : > { %v2978_v9 = vpop.f32.mrf.mxu0 }
 0x667   : > { %v2371_v10 = vadd.f32 %v2978_v9, %v3677_v40 }
 0x668   : > { %v3002_v11 = vpop.f32.mrf.mxu1  ;;  %v2365_v12 = vpop.f32.mrf.mxu0 }
 0x669   : > { %2493 = vst.msk [vmem:[%s3683_s0 + $0x48] sm:$0xff] %vm894_vm0, %v2371_v10  ;;  %v2451_v13 = vadd.f32 %v3002_v11, %v3677_v40  ;;  %v2366_v14 = vadd.f32 %v3677_v40, %v2365_v12 }
 0x66a   : > { %v2445_v15 = vpop.f32.mrf.mxu1 }
 0x66b   : > { %2509 = vst.msk [vmem:[%s3683_s0 + $0xc8] sm:$0xff] %vm894_vm0, %v2451_v13  ;;  %2492 = vst.msk [vmem:[%s3683_s0 + $0x40] sm:$0xff] %vm894_vm0, %v2366_v14  ;;  %v2446_v16 = vadd.f32 %v3677_v40, %v2445_v15 }
 0x66d   : > { %2508 = vst.msk [vmem:[%s3683_s0 + $0xc0] sm:$0xff] %vm894_vm0, %v2446_v16 }
 0x66e   : > { %v2981_v17 = vpop.f32.mrf.mxu0 }
 0x66f   : > { %v2381_v18 = vadd.f32 %v2981_v17, %v3677_v40 }
 0x670   : > { %v3005_v19 = vpop.f32.mrf.mxu1  ;;  %v2375_v20 = vpop.f32.mrf.mxu0 }
 0x671   : > { %2495 = vst.msk [vmem:[%s3683_s0 + $0x58] sm:$0xff] %vm894_vm0, %v2381_v18  ;;  %v2461_v21 = vadd.f32 %v3005_v19, %v3677_v40  ;;  %v2376_v22 = vadd.f32 %v3677_v40, %v2375_v20 }
 0x672   : > { %v2455_v23 = vpop.f32.mrf.mxu1 }
 0x673   : > { %2511 = vst.msk [vmem:[%s3683_s0 + $0xd8] sm:$0xff] %vm894_vm0, %v2461_v21  ;;  %2494 = vst.msk [vmem:[%s3683_s0 + $0x50] sm:$0xff] %vm894_vm0, %v2376_v22  ;;  %v2456_v24 = vadd.f32 %v3677_v40, %v2455_v23 }
 0x675   : > { %2510 = vst.msk [vmem:[%s3683_s0 + $0xd0] sm:$0xff] %vm894_vm0, %v2456_v24 }
 0x676   : > { %v2984_v25 = vpop.f32.mrf.mxu0 }
 0x677   : > { %v2391_v26 = vadd.f32 %v2984_v25, %v3677_v40 }
 0x678   : > { %v3008_v27 = vpop.f32.mrf.mxu1  ;;  %v2385_v28 = vpop.f32.mrf.mxu0 }
 0x679   : > { %2497 = vst.msk [vmem:[%s3683_s0 + $0x68] sm:$0xff] %vm894_vm0, %v2391_v26  ;;  %v2471_v29 = vadd.f32 %v3008_v27, %v3677_v40  ;;  %v2386_v30 = vadd.f32 %v3677_v40, %v2385_v28 }
 0x67a   : > { %v2465_v31 = vpop.f32.mrf.mxu1 }
 0x67b   : > { %2513 = vst.msk [vmem:[%s3683_s0 + $0xe8] sm:$0xff] %vm894_vm0, %v2471_v29  ;;  %2496 = vst.msk [vmem:[%s3683_s0 + $0x60] sm:$0xff] %vm894_vm0, %v2386_v30  ;;  %v2466_v32 = vadd.f32 %v3677_v40, %v2465_v31 }
 0x67d   : > { %2512 = vst.msk [vmem:[%s3683_s0 + $0xe0] sm:$0xff] %vm894_vm0, %v2466_v32 }
 0x67e   : > { %v2987_v33 = vpop.f32.mrf.mxu0 }
 0x67f   : > { %v2401_v34 = vadd.f32 %v2987_v33, %v3677_v40 }
 0x680   : > { %v3011_v35 = vpop.f32.mrf.mxu1  ;;  %v2395_v36 = vpop.f32.mrf.mxu0 }
 0x681   : > { %2499 = vst.msk [vmem:[%s3683_s0 + $0x78] sm:$0xff] %vm894_vm0, %v2401_v34  ;;  %v2481_v37 = vadd.f32 %v3011_v35, %v3677_v40  ;;  %v2396_v38 = vadd.f32 %v3677_v40, %v2395_v36 }
 0x682   : > { %v2475_v39 = vpop.f32.mrf.mxu1 }
 0x683   : > { %2515 = vst.msk [vmem:[%s3683_s0 + $0xf8] sm:$0xff] %vm894_vm0, %v2481_v37  ;;  %2498 = vst.msk [vmem:[%s3683_s0 + $0x70] sm:$0xff] %vm894_vm0, %v2396_v38  ;;  %v2476_v41 = vadd.f32 %v3677_v40, %v2475_v39 }
 0x685   : > { %2514 = vst.msk [vmem:[%s3683_s0 + $0xf0] sm:$0xff] %vm894_vm0, %v2476_v41 }
 0x686 PF: > { %s27_s24 = sadd.s32 1, %s3038_s24  }
 0x687   : > { %p24_p4 = scmp.ge.s32.totalorder %s27_s24, 4  }
 0x689   :  { %26 = sbr.rel (!%p24_p4) target bundleno = 3 (0x3), region = 124 }

</bundles_post_ra>
